<compile_context>
chip_gen: v6e
topology: v6e:2x2x1
jax: 0.10.0
libtpu: 0.0.40
codegen_flags: <defaults>
</compile_context>

<pallas_src>
import functools
import math

import jax
import jax.numpy as jnp
from jax import lax
from jax.experimental import pallas as pl
from jax.experimental.pallas import tpu as pltpu

F32 = jnp.float32
BF16 = jnp.bfloat16
NEG_INF = -1e30
SEQ_ALIGN = 16        # bf16 sublane granule -> per-batch row offsets stay aligned


def _round_up(x, m):
    return (x + m - 1) // m * m


# --------------------------- fused MHA Pallas kernel ---------------------------

def _mha_kernel(q_ref, k_ref, v_ref, wq_ref, wk_ref, wv_ref, wfc_ref, o_ref, *,
                n_head, d_k, d_v, b_blk, len_q, len_k, inv_temperature):
    """One grid step == one block of b_blk batch elements, all heads inside."""
    rows_q, _ = q_ref.shape
    rows_k = k_ref.shape[0]
    lq_pad = rows_q // b_blk
    lk_pad = rows_k // b_blk
    hdk = n_head * d_k
    hdv = n_head * d_v

    q_bf = q_ref[...]                                   # (b_blk*lq_pad, d_pad) bf16
    k_bf = k_ref[...]
    v_bf = v_ref[...]

    # Dense projections for the whole batch block (bf16 operands, f32 acc);
    # results are cast back to bf16 right away (only consumed as bf16 below).
    q_all = jnp.dot(q_bf, wq_ref[...], preferred_element_type=F32).astype(BF16)
    kq_all = jnp.dot(q_bf, wk_ref[...], preferred_element_type=F32).astype(BF16)
    vq_all = jnp.dot(q_bf, wv_ref[...], preferred_element_type=F32).astype(BF16)
    kk_all = jnp.dot(k_bf, wk_ref[...], preferred_element_type=F32).astype(BF16)
    vv_all = jnp.dot(v_bf, wv_ref[...], preferred_element_type=F32).astype(BF16)

    # Hoisted per-head 0/1 lane masks: selecting head h of the packed dim via a
    # VPU multiply keeps every matmul operand lane-aligned (no <128 lane slices).
    lane_k = lax.broadcasted_iota(jnp.int32, (lq_pad, hdk), 1)
    lane_v = lax.broadcasted_iota(jnp.int32, (lq_pad, hdv), 1)
    qmask = [((lane_k >= h * d_k) & (lane_k < (h + 1) * d_k)).astype(BF16)
             for h in range(n_head)]
    vmask = [((lane_v >= h * d_v) & (lane_v < (h + 1) * d_v)).astype(F32)
             for h in range(n_head)]

    # Additive key-padding biases, built once (only if padding exists).
    bias_q = bias_k = None
    if lq_pad != len_q:
        bias_q = jnp.where(
            lax.broadcasted_iota(jnp.int32, (lq_pad, lq_pad), 1) < len_q,
            0.0, NEG_INF).astype(F32)
    if lk_pad != len_k:
        bias_k = jnp.where(
            lax.broadcasted_iota(jnp.int32, (lq_pad, lk_pad), 1) < len_k,
            0.0, NEG_INF).astype(F32)

    dims_nt = (((1,), (1,)), ((), ()))                  # A @ B.T

    for b in range(b_blk):                              # static unroll: batch block
        r0q, r0k = b * lq_pad, b * lk_pad
        qb = q_all[r0q:r0q + lq_pad, :]                 # (lq_pad, hdk) bf16
        kqb = kq_all[r0q:r0q + lq_pad, :]               # keys derived from q
        vqb = vq_all[r0q:r0q + lq_pad, :]               # values derived from q
        kkb = kk_all[r0k:r0k + lk_pad, :]               # keys derived from k
        vvb = vv_all[r0k:r0k + lk_pad, :]               # values derived from v

        o_cat = jnp.zeros((lq_pad, hdv), F32)           # head-concat attn output
        for h in range(n_head):                         # static unroll: heads
            qh = qb * qmask[h]                          # only head-h lanes survive
            # Logits against cat([q, k]) keys, kept as two blocks (no concat /
            # scratch round trip); joint softmax in f32.
            s_q = lax.dot_general(qh, kqb, dims_nt,
                                  preferred_element_type=F32) * inv_temperature
            s_k = lax.dot_general(qh, kkb, dims_nt,
                                  preferred_element_type=F32) * inv_temperature
            if bias_q is not None:
                s_q = s_q + bias_q
            if bias_k is not None:
                s_k = s_k + bias_k
            m = jnp.maximum(jnp.max(s_q, axis=-1, keepdims=True),
                            jnp.max(s_k, axis=-1, keepdims=True))
            p_q = jnp.exp(s_q - m)
            p_k = jnp.exp(s_k - m)
            denom = (jnp.sum(p_q, axis=-1, keepdims=True)
                     + jnp.sum(p_k, axis=-1, keepdims=True))
            inv_denom = pl.reciprocal(denom, approx=True)       # EUP slot, ~free
            # TODO(synk): attention dropout is eval-mode identity.

            num = (jnp.dot(p_q.astype(BF16), vqb, preferred_element_type=F32)
                   + jnp.dot(p_k.astype(BF16), vvb, preferred_element_type=F32))
            # Head-h columns of `num` hold the real head output; mask the rest.
            o_cat = o_cat + (num * inv_denom) * vmask[h]

        # One dense fc matmul per batch element (K = n_head*d_v).
        out_b = jnp.dot(o_cat.astype(BF16), wfc_ref[...],
                        preferred_element_type=F32)     # (lq_pad, d_pad)
        # TODO(synk): output dropout is eval-mode identity; residual is added
        # in f32 outside the kernel.
        o_ref[r0q:r0q + lq_pad, :] = out_b


# ------------------------------ weight packing ----------------------------------

def pack_mha_weights(w_qs, w_ks, w_vs, w_fc, *, n_head, d_k, d_v):
    """Pack torch-layout Linear weights once (dense head packing, bf16).

    torch layouts: w_qs/w_ks: (n_head*d_k, d_model), w_vs: (n_head*d_v, d_model),
    w_fc: (d_model, n_head*d_v); Linear computes y = x @ W.T.
    """
    hdk, d_model = w_qs.shape
    assert hdk == n_head * d_k
    d_pad = _round_up(d_model, 128)
    pad_rows = ((0, d_pad - d_model), (0, 0))
    wq_p = jnp.pad(jnp.transpose(w_qs), pad_rows).astype(BF16)    # (d_pad, H*d_k)
    wk_p = jnp.pad(jnp.transpose(w_ks), pad_rows).astype(BF16)    # (d_pad, H*d_k)
    wv_p = jnp.pad(jnp.transpose(w_vs), pad_rows).astype(BF16)    # (d_pad, H*d_v)
    wfc_p = jnp.pad(jnp.transpose(w_fc),
                    ((0, 0), (0, d_pad - d_model))).astype(BF16)  # (H*d_v, d_pad)
    return wq_p, wk_p, wv_p, wfc_p


# --------------------------------- wrapper ---------------------------------------

def multi_head_attention(q, k, v, packed_weights, *, n_head, d_k, d_v,
                         batch_block=8):
    wq_p, wk_p, wv_p, wfc_p = packed_weights
    sz_b, len_q, d_model = q.shape
    _, len_k, _ = k.shape
    _, len_v, _ = v.shape
    assert len_k == len_v, "attention requires len_k == len_v"

    d_pad = _round_up(d_model, 128)
    assert wq_p.shape[0] == d_pad
    lq_pad = _round_up(len_q, SEQ_ALIGN)
    lk_pad = _round_up(len_k, SEQ_ALIGN)
    b_blk = min(sz_b, batch_block)              # fold batches into one grid step
    sz_b_pad = _round_up(sz_b, b_blk)
    n_blocks = sz_b_pad // b_blk

    def prep(x, length, l_pad):
        x = jnp.pad(x, ((0, sz_b_pad - sz_b), (0, l_pad - length),
                        (0, d_pad - d_model)))
        return x.reshape(sz_b_pad * l_pad, d_pad).astype(BF16)

    q_p = prep(q, len_q, lq_pad)
    k_p = prep(k, len_k, lk_pad)
    v_p = prep(v, len_v, lk_pad)

    kernel = functools.partial(
        _mha_kernel, n_head=n_head, d_k=d_k, d_v=d_v, b_blk=b_blk,
        len_q=len_q, len_k=len_k, inv_temperature=1.0 / float(d_k) ** 0.5)

    out = pl.pallas_call(
        kernel,
        grid=(n_blocks,),
        in_specs=[
            pl.BlockSpec((b_blk * lq_pad, d_pad), lambda b: (b, 0)),
            pl.BlockSpec((b_blk * lk_pad, d_pad), lambda b: (b, 0)),
            pl.BlockSpec((b_blk * lk_pad, d_pad), lambda b: (b, 0)),
            # Weights: block-resident (constant index_map), densely packed.
            pl.BlockSpec(wq_p.shape, lambda b: (0, 0)),
            pl.BlockSpec(wk_p.shape, lambda b: (0, 0)),
            pl.BlockSpec(wv_p.shape, lambda b: (0, 0)),
            pl.BlockSpec(wfc_p.shape, lambda b: (0, 0)),
        ],
        out_specs=pl.BlockSpec((b_blk * lq_pad, d_pad), lambda b: (b, 0)),
        out_shape=jax.ShapeDtypeStruct((sz_b_pad * lq_pad, d_pad), F32),
        compiler_params=pltpu.CompilerParams(
            dimension_semantics=("parallel",),          # megacore sharding on v7x
            vmem_limit_bytes=32 * 1024 * 1024),         # tiny blocks; safe everywhere
    )(q_p, k_p, v_p, wq_p, wk_p, wv_p, wfc_p)

    out = out.reshape(sz_b_pad, lq_pad, d_pad)[:sz_b, :len_q, :d_model]
    return out + q                                      # residual add in f32


# ------------------------------ pure-JAX reference ------------------------------

def mha_reference(q, k, v, w_qs, w_ks, w_vs, w_fc, *, n_head, d_k, d_v):
    sz_b, len_q, d_model = q.shape
    residual = q
    kc = jnp.concatenate([q, k], axis=1)
    vc = jnp.concatenate([q, v], axis=1)
    qh = jnp.einsum('bld,hkd->bhlk', q, w_qs.reshape(n_head, d_k, d_model),
                    precision='highest')
    kh = jnp.einsum('bld,hkd->bhlk', kc, w_ks.reshape(n_head, d_k, d_model),
                    precision='highest')
    vh = jnp.einsum('bld,hkd->bhlk', vc, w_vs.reshape(n_head, d_v, d_model),
                    precision='highest')
    attn = jnp.einsum('bhqk,bhlk->bhql', qh, kh,
                      precision='highest') / float(d_k) ** 0.5
    attn = jax.nn.softmax(attn, axis=-1)
    out = jnp.einsum('bhql,bhlv->bhqv', attn, vh, precision='highest')
    out = out.transpose(0, 2, 1, 3).reshape(sz_b, len_q, n_head * d_v)
    out = jnp.einsum('blv,dv->bld', out, w_fc, precision='highest')
    return out + residual


# ------------------------------------ main ---------------------------------------

if __name__ == "__main__":
    sz_b, len_q, len_k = 2, 8, 8
    d_model, n_head, d_k, d_v = 32, 2, 16, 16

    key = jax.random.PRNGKey(0)
    kq, kk, kv, k1, k2, k3, k4 = jax.random.split(key, 7)
    q = jax.random.normal(kq, (sz_b, len_q, d_model), F32)
    k = jax.random.normal(kk, (sz_b, len_k, d_model), F32)
    v = jax.random.normal(kv, (sz_b, len_k, d_model), F32)

    # Same init distributions as the PyTorch module.
    std_qk = math.sqrt(2.0 / (d_model + d_k))
    std_v = math.sqrt(2.0 / (d_model + d_v))
    w_qs = std_qk * jax.random.normal(k1, (n_head * d_k, d_model), F32)
    w_ks = std_qk * jax.random.normal(k2, (n_head * d_k, d_model), F32)
    w_vs = std_v * jax.random.normal(k3, (n_head * d_v, d_model), F32)
    w_fc = math.sqrt(2.0 / (d_model + n_head * d_v)) * \
        jax.random.normal(k4, (d_model, n_head * d_v), F32)     # xavier_normal_

    # Pack weights ONCE (hoisted out of the forward path).
    packed = pack_mha_weights(w_qs, w_ks, w_vs, w_fc,
                              n_head=n_head, d_k=d_k, d_v=d_v)

    out = multi_head_attention(q, k, v, packed,
                               n_head=n_head, d_k=d_k, d_v=d_v)
    out = jax.block_until_ready(out)

    ref = mha_reference(q, k, v, w_qs, w_ks, w_vs, w_fc,
                        n_head=n_head, d_k=d_k, d_v=d_v)

    assert out.shape == (sz_b, len_q, d_model)
    assert bool(jnp.all(jnp.isfinite(out)))
    max_err = float(jnp.max(jnp.abs(out - ref)))
    # Loose tolerance: kernel uses bf16 matmul operands + approx reciprocal.
    assert max_err < 0.2, f"max abs error vs reference: {max_err}"
    print("KERNEL_OK")
</pallas_src>

<mosaic_0001>
module attributes {stable_mosaic.version = 11 : i64} {
  func.func @_mha_kernel(%arg0: i32, %arg1: memref<32x128xbf16, #tpu.memory_space<vmem>>, %arg2: memref<32x128xbf16, #tpu.memory_space<vmem>>, %arg3: memref<32x128xbf16, #tpu.memory_space<vmem>>, %arg4: memref<128x32xbf16, #tpu.memory_space<vmem>>, %arg5: memref<128x32xbf16, #tpu.memory_space<vmem>>, %arg6: memref<128x32xbf16, #tpu.memory_space<vmem>>, %arg7: memref<32x128xbf16, #tpu.memory_space<vmem>>, %arg8: memref<32x128xf32, #tpu.memory_space<vmem>>) attributes {dimension_semantics = [#tpu.dimension_semantics<parallel>], iteration_bounds = array<i64: 1>, scalar_prefetch = 0 : i64, scratch_operands = 0 : i64, tpu.core_type = #tpu.core_type<tc>, window_params = [{transform_indices = @transform_0, window_bounds = array<i64: 32, 128>}, {transform_indices = @transform_1, window_bounds = array<i64: 32, 128>}, {transform_indices = @transform_2, window_bounds = array<i64: 32, 128>}, {pipeline_mode = #tpu.pipeline_mode<synchronous>, transform_indices = @transform_3, window_bounds = array<i64: 128, 32>}, {pipeline_mode = #tpu.pipeline_mode<synchronous>, transform_indices = @transform_4, window_bounds = array<i64: 128, 32>}, {pipeline_mode = #tpu.pipeline_mode<synchronous>, transform_indices = @transform_5, window_bounds = array<i64: 128, 32>}, {pipeline_mode = #tpu.pipeline_mode<synchronous>, transform_indices = @transform_6, window_bounds = array<i64: 32, 128>}, {transform_indices = @transform_7, window_bounds = array<i64: 32, 128>}]} {
    %c0 = arith.constant 0 : index
    %c0_0 = arith.constant 0 : index
    %0 = vector.load %arg1[%c0, %c0_0] : memref<32x128xbf16, #tpu.memory_space<vmem>>, vector<32x128xbf16>
    %c0_1 = arith.constant 0 : index
    %c0_2 = arith.constant 0 : index
    %1 = vector.load %arg2[%c0_1, %c0_2] : memref<32x128xbf16, #tpu.memory_space<vmem>>, vector<32x128xbf16>
    %c0_3 = arith.constant 0 : index
    %c0_4 = arith.constant 0 : index
    %2 = vector.load %arg3[%c0_3, %c0_4] : memref<32x128xbf16, #tpu.memory_space<vmem>>, vector<32x128xbf16>
    %c0_5 = arith.constant 0 : index
    %c0_6 = arith.constant 0 : index
    %3 = vector.load %arg4[%c0_5, %c0_6] : memref<128x32xbf16, #tpu.memory_space<vmem>>, vector<128x32xbf16>
    %cst = arith.constant dense<0.000000e+00> : vector<32x32xf32>
    %4 = tpu.matmul %0, %3, %cst {dimension_numbers = #tpu.dot_dimension_numbers<[1], [0], [0], [1], [0, 0, 1, 1], [], []>} : vector<32x128xbf16>, vector<128x32xbf16>, vector<32x32xf32> -> vector<32x32xf32>
    %5 = arith.truncf %4 : vector<32x32xf32> to vector<32x32xbf16>
    %c0_7 = arith.constant 0 : index
    %c0_8 = arith.constant 0 : index
    %6 = vector.load %arg5[%c0_7, %c0_8] : memref<128x32xbf16, #tpu.memory_space<vmem>>, vector<128x32xbf16>
    %cst_9 = arith.constant dense<0.000000e+00> : vector<32x32xf32>
    %7 = tpu.matmul %0, %6, %cst_9 {dimension_numbers = #tpu.dot_dimension_numbers<[1], [0], [0], [1], [0, 0, 1, 1], [], []>} : vector<32x128xbf16>, vector<128x32xbf16>, vector<32x32xf32> -> vector<32x32xf32>
    %8 = arith.truncf %7 : vector<32x32xf32> to vector<32x32xbf16>
    %c0_10 = arith.constant 0 : index
    %c0_11 = arith.constant 0 : index
    %9 = vector.load %arg6[%c0_10, %c0_11] : memref<128x32xbf16, #tpu.memory_space<vmem>>, vector<128x32xbf16>
    %cst_12 = arith.constant dense<0.000000e+00> : vector<32x32xf32>
    %10 = tpu.matmul %0, %9, %cst_12 {dimension_numbers = #tpu.dot_dimension_numbers<[1], [0], [0], [1], [0, 0, 1, 1], [], []>} : vector<32x128xbf16>, vector<128x32xbf16>, vector<32x32xf32> -> vector<32x32xf32>
    %11 = arith.truncf %10 : vector<32x32xf32> to vector<32x32xbf16>
    %c0_13 = arith.constant 0 : index
    %c0_14 = arith.constant 0 : index
    %12 = vector.load %arg5[%c0_13, %c0_14] : memref<128x32xbf16, #tpu.memory_space<vmem>>, vector<128x32xbf16>
    %cst_15 = arith.constant dense<0.000000e+00> : vector<32x32xf32>
    %13 = tpu.matmul %1, %12, %cst_15 {dimension_numbers = #tpu.dot_dimension_numbers<[1], [0], [0], [1], [0, 0, 1, 1], [], []>} : vector<32x128xbf16>, vector<128x32xbf16>, vector<32x32xf32> -> vector<32x32xf32>
    %14 = arith.truncf %13 : vector<32x32xf32> to vector<32x32xbf16>
    %c0_16 = arith.constant 0 : index
    %c0_17 = arith.constant 0 : index
    %15 = vector.load %arg6[%c0_16, %c0_17] : memref<128x32xbf16, #tpu.memory_space<vmem>>, vector<128x32xbf16>
    %cst_18 = arith.constant dense<0.000000e+00> : vector<32x32xf32>
    %16 = tpu.matmul %2, %15, %cst_18 {dimension_numbers = #tpu.dot_dimension_numbers<[1], [0], [0], [1], [0, 0, 1, 1], [], []>} : vector<32x128xbf16>, vector<128x32xbf16>, vector<32x32xf32> -> vector<32x32xf32>
    %17 = arith.truncf %16 : vector<32x32xf32> to vector<32x32xbf16>
    %18 = tpu.iota {dimensions = array<i32: 1>} : vector<16x32xi32>
    %19 = tpu.iota {dimensions = array<i32: 1>} : vector<16x32xi32>
    %c0_i32 = arith.constant 0 : i32
    %20 = vector.broadcast %c0_i32 : i32 to vector<16x32xi32>
    %21 = arith.cmpi sge, %18, %20 : vector<16x32xi32>
    %c16_i32 = arith.constant 16 : i32
    %22 = vector.broadcast %c16_i32 : i32 to vector<16x32xi32>
    %23 = arith.cmpi slt, %18, %22 : vector<16x32xi32>
    %24 = arith.andi %21, %23 : vector<16x32xi1>
    %25 = arith.extui %24 : vector<16x32xi1> to vector<16x32xi32>
    %26 = arith.sitofp %25 : vector<16x32xi32> to vector<16x32xf32>
    %27 = arith.truncf %26 : vector<16x32xf32> to vector<16x32xbf16>
    %c16_i32_19 = arith.constant 16 : i32
    %28 = vector.broadcast %c16_i32_19 : i32 to vector<16x32xi32>
    %29 = arith.cmpi sge, %18, %28 : vector<16x32xi32>
    %c32_i32 = arith.constant 32 : i32
    %30 = vector.broadcast %c32_i32 : i32 to vector<16x32xi32>
    %31 = arith.cmpi slt, %18, %30 : vector<16x32xi32>
    %32 = arith.andi %29, %31 : vector<16x32xi1>
    %33 = arith.extui %32 : vector<16x32xi1> to vector<16x32xi32>
    %34 = arith.sitofp %33 : vector<16x32xi32> to vector<16x32xf32>
    %35 = arith.truncf %34 : vector<16x32xf32> to vector<16x32xbf16>
    %c0_i32_20 = arith.constant 0 : i32
    %36 = vector.broadcast %c0_i32_20 : i32 to vector<16x32xi32>
    %37 = arith.cmpi sge, %19, %36 : vector<16x32xi32>
    %c16_i32_21 = arith.constant 16 : i32
    %38 = vector.broadcast %c16_i32_21 : i32 to vector<16x32xi32>
    %39 = arith.cmpi slt, %19, %38 : vector<16x32xi32>
    %40 = arith.andi %37, %39 : vector<16x32xi1>
    %41 = arith.extui %40 : vector<16x32xi1> to vector<16x32xi32>
    %42 = arith.sitofp %41 : vector<16x32xi32> to vector<16x32xf32>
    %c16_i32_22 = arith.constant 16 : i32
    %43 = vector.broadcast %c16_i32_22 : i32 to vector<16x32xi32>
    %44 = arith.cmpi sge, %19, %43 : vector<16x32xi32>
    %c32_i32_23 = arith.constant 32 : i32
    %45 = vector.broadcast %c32_i32_23 : i32 to vector<16x32xi32>
    %46 = arith.cmpi slt, %19, %45 : vector<16x32xi32>
    %47 = arith.andi %44, %46 : vector<16x32xi1>
    %48 = arith.extui %47 : vector<16x32xi1> to vector<16x32xi32>
    %49 = arith.sitofp %48 : vector<16x32xi32> to vector<16x32xf32>
    %50 = tpu.iota {dimensions = array<i32: 1>} : vector<16x16xi32>
    %c8_i32 = arith.constant 8 : i32
    %51 = vector.broadcast %c8_i32 : i32 to vector<16x16xi32>
    %52 = arith.cmpi slt, %50, %51 : vector<16x16xi32>
    %cst_24 = arith.constant 0.000000e+00 : f32
    %cst_25 = arith.constant -1.000000e+30 : f32
    %53 = vector.broadcast %cst_24 : f32 to vector<16x16xf32>
    %54 = vector.broadcast %cst_25 : f32 to vector<16x16xf32>
    %55 = arith.select %52, %53, %54 : vector<16x16xi1>, vector<16x16xf32>
    %56 = tpu.iota {dimensions = array<i32: 1>} : vector<16x16xi32>
    %c8_i32_26 = arith.constant 8 : i32
    %57 = vector.broadcast %c8_i32_26 : i32 to vector<16x16xi32>
    %58 = arith.cmpi slt, %56, %57 : vector<16x16xi32>
    %cst_27 = arith.constant 0.000000e+00 : f32
    %cst_28 = arith.constant -1.000000e+30 : f32
    %59 = vector.broadcast %cst_27 : f32 to vector<16x16xf32>
    %60 = vector.broadcast %cst_28 : f32 to vector<16x16xf32>
    %61 = arith.select %58, %59, %60 : vector<16x16xi1>, vector<16x16xf32>
    %62 = vector.extract_strided_slice %5 {offsets = [0, 0], sizes = [16, 32], strides = [1, 1]} : vector<32x32xbf16> to vector<16x32xbf16>
    %63 = vector.extract_strided_slice %8 {offsets = [0, 0], sizes = [16, 32], strides = [1, 1]} : vector<32x32xbf16> to vector<16x32xbf16>
    %64 = vector.extract_strided_slice %11 {offsets = [0, 0], sizes = [16, 32], strides = [1, 1]} : vector<32x32xbf16> to vector<16x32xbf16>
    %65 = vector.extract_strided_slice %14 {offsets = [0, 0], sizes = [16, 32], strides = [1, 1]} : vector<32x32xbf16> to vector<16x32xbf16>
    %66 = vector.extract_strided_slice %17 {offsets = [0, 0], sizes = [16, 32], strides = [1, 1]} : vector<32x32xbf16> to vector<16x32xbf16>
    %cst_29 = arith.constant 0.000000e+00 : f32
    %67 = vector.broadcast %cst_29 : f32 to vector<16x32xf32>
    %68 = arith.mulf %62, %27 : vector<16x32xbf16>
    %cst_30 = arith.constant dense<0.000000e+00> : vector<16x16xf32>
    %69 = tpu.matmul %68, %63, %cst_30 {dimension_numbers = #tpu.dot_dimension_numbers<[1], [1], [0], [0], [0, 0, 1, 0], [], []>} : vector<16x32xbf16>, vector<16x32xbf16>, vector<16x16xf32> -> vector<16x16xf32>
    %cst_31 = arith.constant 2.500000e-01 : f32
    %70 = vector.broadcast %cst_31 : f32 to vector<16x16xf32>
    %71 = arith.mulf %69, %70 : vector<16x16xf32>
    %cst_32 = arith.constant dense<0.000000e+00> : vector<16x16xf32>
    %72 = tpu.matmul %68, %65, %cst_32 {dimension_numbers = #tpu.dot_dimension_numbers<[1], [1], [0], [0], [0, 0, 1, 0], [], []>} : vector<16x32xbf16>, vector<16x32xbf16>, vector<16x16xf32> -> vector<16x16xf32>
    %cst_33 = arith.constant 2.500000e-01 : f32
    %73 = vector.broadcast %cst_33 : f32 to vector<16x16xf32>
    %74 = arith.mulf %72, %73 : vector<16x16xf32>
    %75 = arith.addf %71, %55 : vector<16x16xf32>
    %76 = arith.addf %74, %61 : vector<16x16xf32>
    %cst_34 = arith.constant dense<0xFF800000> : vector<16xf32>
    %77 = vector.multi_reduction <maximumf>, %75, %cst_34 [1] : vector<16x16xf32> to vector<16xf32>
    %78 = vector.shape_cast %77 : vector<16xf32> to vector<16x1xf32>
    %cst_35 = arith.constant dense<0xFF800000> : vector<16xf32>
    %79 = vector.multi_reduction <maximumf>, %76, %cst_35 [1] : vector<16x16xf32> to vector<16xf32>
    %80 = vector.shape_cast %79 : vector<16xf32> to vector<16x1xf32>
    %81 = arith.maximumf %78, %80 : vector<16x1xf32>
    %82 = vector.broadcast %81 : vector<16x1xf32> to vector<16x16xf32>
    %83 = arith.subf %75, %82 : vector<16x16xf32>
    %84 = math.exp %83 : vector<16x16xf32>
    %85 = vector.broadcast %81 : vector<16x1xf32> to vector<16x16xf32>
    %86 = arith.subf %76, %85 : vector<16x16xf32>
    %87 = math.exp %86 : vector<16x16xf32>
    %cst_36 = arith.constant dense<0.000000e+00> : vector<16xf32>
    %88 = vector.multi_reduction <add>, %84, %cst_36 [1] : vector<16x16xf32> to vector<16xf32>
    %89 = vector.shape_cast %88 : vector<16xf32> to vector<16x1xf32>
    %cst_37 = arith.constant dense<0.000000e+00> : vector<16xf32>
    %90 = vector.multi_reduction <add>, %87, %cst_37 [1] : vector<16x16xf32> to vector<16xf32>
    %91 = vector.shape_cast %90 : vector<16xf32> to vector<16x1xf32>
    %92 = arith.addf %89, %91 : vector<16x1xf32>
    %93 = tpu.reciprocal %92 {approx = true} : vector<16x1xf32> -> vector<16x1xf32>
    %94 = arith.truncf %84 : vector<16x16xf32> to vector<16x16xbf16>
    %cst_38 = arith.constant dense<0.000000e+00> : vector<16x32xf32>
    %95 = tpu.matmul %94, %64, %cst_38 {dimension_numbers = #tpu.dot_dimension_numbers<[1], [0], [0], [1], [0, 0, 1, 1], [], []>} : vector<16x16xbf16>, vector<16x32xbf16>, vector<16x32xf32> -> vector<16x32xf32>
    %96 = arith.truncf %87 : vector<16x16xf32> to vector<16x16xbf16>
    %cst_39 = arith.constant dense<0.000000e+00> : vector<16x32xf32>
    %97 = tpu.matmul %96, %66, %cst_39 {dimension_numbers = #tpu.dot_dimension_numbers<[1], [0], [0], [1], [0, 0, 1, 1], [], []>} : vector<16x16xbf16>, vector<16x32xbf16>, vector<16x32xf32> -> vector<16x32xf32>
    %98 = arith.addf %95, %97 : vector<16x32xf32>
    %99 = vector.broadcast %93 : vector<16x1xf32> to vector<16x32xf32>
    %100 = arith.mulf %98, %99 : vector<16x32xf32>
    %101 = arith.mulf %100, %42 : vector<16x32xf32>
    %102 = arith.addf %67, %101 : vector<16x32xf32>
    %103 = arith.mulf %62, %35 : vector<16x32xbf16>
    %cst_40 = arith.constant dense<0.000000e+00> : vector<16x16xf32>
    %104 = tpu.matmul %103, %63, %cst_40 {dimension_numbers = #tpu.dot_dimension_numbers<[1], [1], [0], [0], [0, 0, 1, 0], [], []>} : vector<16x32xbf16>, vector<16x32xbf16>, vector<16x16xf32> -> vector<16x16xf32>
    %cst_41 = arith.constant 2.500000e-01 : f32
    %105 = vector.broadcast %cst_41 : f32 to vector<16x16xf32>
    %106 = arith.mulf %104, %105 : vector<16x16xf32>
    %cst_42 = arith.constant dense<0.000000e+00> : vector<16x16xf32>
    %107 = tpu.matmul %103, %65, %cst_42 {dimension_numbers = #tpu.dot_dimension_numbers<[1], [1], [0], [0], [0, 0, 1, 0], [], []>} : vector<16x32xbf16>, vector<16x32xbf16>, vector<16x16xf32> -> vector<16x16xf32>
    %cst_43 = arith.constant 2.500000e-01 : f32
    %108 = vector.broadcast %cst_43 : f32 to vector<16x16xf32>
    %109 = arith.mulf %107, %108 : vector<16x16xf32>
    %110 = arith.addf %106, %55 : vector<16x16xf32>
    %111 = arith.addf %109, %61 : vector<16x16xf32>
    %cst_44 = arith.constant dense<0xFF800000> : vector<16xf32>
    %112 = vector.multi_reduction <maximumf>, %110, %cst_44 [1] : vector<16x16xf32> to vector<16xf32>
    %113 = vector.shape_cast %112 : vector<16xf32> to vector<16x1xf32>
    %cst_45 = arith.constant dense<0xFF800000> : vector<16xf32>
    %114 = vector.multi_reduction <maximumf>, %111, %cst_45 [1] : vector<16x16xf32> to vector<16xf32>
    %115 = vector.shape_cast %114 : vector<16xf32> to vector<16x1xf32>
    %116 = arith.maximumf %113, %115 : vector<16x1xf32>
    %117 = vector.broadcast %116 : vector<16x1xf32> to vector<16x16xf32>
    %118 = arith.subf %110, %117 : vector<16x16xf32>
    %119 = math.exp %118 : vector<16x16xf32>
    %120 = vector.broadcast %116 : vector<16x1xf32> to vector<16x16xf32>
    %121 = arith.subf %111, %120 : vector<16x16xf32>
    %122 = math.exp %121 : vector<16x16xf32>
    %cst_46 = arith.constant dense<0.000000e+00> : vector<16xf32>
    %123 = vector.multi_reduction <add>, %119, %cst_46 [1] : vector<16x16xf32> to vector<16xf32>
    %124 = vector.shape_cast %123 : vector<16xf32> to vector<16x1xf32>
    %cst_47 = arith.constant dense<0.000000e+00> : vector<16xf32>
    %125 = vector.multi_reduction <add>, %122, %cst_47 [1] : vector<16x16xf32> to vector<16xf32>
    %126 = vector.shape_cast %125 : vector<16xf32> to vector<16x1xf32>
    %127 = arith.addf %124, %126 : vector<16x1xf32>
    %128 = tpu.reciprocal %127 {approx = true} : vector<16x1xf32> -> vector<16x1xf32>
    %129 = arith.truncf %119 : vector<16x16xf32> to vector<16x16xbf16>
    %cst_48 = arith.constant dense<0.000000e+00> : vector<16x32xf32>
    %130 = tpu.matmul %129, %64, %cst_48 {dimension_numbers = #tpu.dot_dimension_numbers<[1], [0], [0], [1], [0, 0, 1, 1], [], []>} : vector<16x16xbf16>, vector<16x32xbf16>, vector<16x32xf32> -> vector<16x32xf32>
    %131 = arith.truncf %122 : vector<16x16xf32> to vector<16x16xbf16>
    %cst_49 = arith.constant dense<0.000000e+00> : vector<16x32xf32>
    %132 = tpu.matmul %131, %66, %cst_49 {dimension_numbers = #tpu.dot_dimension_numbers<[1], [0], [0], [1], [0, 0, 1, 1], [], []>} : vector<16x16xbf16>, vector<16x32xbf16>, vector<16x32xf32> -> vector<16x32xf32>
    %133 = arith.addf %130, %132 : vector<16x32xf32>
    %134 = vector.broadcast %128 : vector<16x1xf32> to vector<16x32xf32>
    %135 = arith.mulf %133, %134 : vector<16x32xf32>
    %136 = arith.mulf %135, %49 : vector<16x32xf32>
    %137 = arith.addf %102, %136 : vector<16x32xf32>
    %138 = arith.truncf %137 : vector<16x32xf32> to vector<16x32xbf16>
    %c0_50 = arith.constant 0 : index
    %c0_51 = arith.constant 0 : index
    %139 = vector.load %arg7[%c0_50, %c0_51] : memref<32x128xbf16, #tpu.memory_space<vmem>>, vector<32x128xbf16>
    %cst_52 = arith.constant dense<0.000000e+00> : vector<16x128xf32>
    %140 = tpu.matmul %138, %139, %cst_52 {dimension_numbers = #tpu.dot_dimension_numbers<[1], [0], [0], [1], [0, 0, 1, 1], [], []>} : vector<16x32xbf16>, vector<32x128xbf16>, vector<16x128xf32> -> vector<16x128xf32>
    %c0_53 = arith.constant 0 : index
    %c0_54 = arith.constant 0 : index
    %141 = vector.load %arg8[%c0_53, %c0_54] : memref<32x128xf32, #tpu.memory_space<vmem>>, vector<16x128xf32>
    tpu.vector_store %arg8[%c0_53, %c0_54], %140 {strides = array<i32>} : memref<32x128xf32, #tpu.memory_space<vmem>>, vector<16x128xf32>,
    %142 = vector.extract_strided_slice %5 {offsets = [16, 0], sizes = [16, 32], strides = [1, 1]} : vector<32x32xbf16> to vector<16x32xbf16>
    %143 = vector.extract_strided_slice %8 {offsets = [16, 0], sizes = [16, 32], strides = [1, 1]} : vector<32x32xbf16> to vector<16x32xbf16>
    %144 = vector.extract_strided_slice %11 {offsets = [16, 0], sizes = [16, 32], strides = [1, 1]} : vector<32x32xbf16> to vector<16x32xbf16>
    %145 = vector.extract_strided_slice %14 {offsets = [16, 0], sizes = [16, 32], strides = [1, 1]} : vector<32x32xbf16> to vector<16x32xbf16>
    %146 = vector.extract_strided_slice %17 {offsets = [16, 0], sizes = [16, 32], strides = [1, 1]} : vector<32x32xbf16> to vector<16x32xbf16>
    %cst_55 = arith.constant 0.000000e+00 : f32
    %147 = vector.broadcast %cst_55 : f32 to vector<16x32xf32>
    %148 = arith.mulf %142, %27 : vector<16x32xbf16>
    %cst_56 = arith.constant dense<0.000000e+00> : vector<16x16xf32>
    %149 = tpu.matmul %148, %143, %cst_56 {dimension_numbers = #tpu.dot_dimension_numbers<[1], [1], [0], [0], [0, 0, 1, 0], [], []>} : vector<16x32xbf16>, vector<16x32xbf16>, vector<16x16xf32> -> vector<16x16xf32>
    %cst_57 = arith.constant 2.500000e-01 : f32
    %150 = vector.broadcast %cst_57 : f32 to vector<16x16xf32>
    %151 = arith.mulf %149, %150 : vector<16x16xf32>
    %cst_58 = arith.constant dense<0.000000e+00> : vector<16x16xf32>
    %152 = tpu.matmul %148, %145, %cst_58 {dimension_numbers = #tpu.dot_dimension_numbers<[1], [1], [0], [0], [0, 0, 1, 0], [], []>} : vector<16x32xbf16>, vector<16x32xbf16>, vector<16x16xf32> -> vector<16x16xf32>
    %cst_59 = arith.constant 2.500000e-01 : f32
    %153 = vector.broadcast %cst_59 : f32 to vector<16x16xf32>
    %154 = arith.mulf %152, %153 : vector<16x16xf32>
    %155 = arith.addf %151, %55 : vector<16x16xf32>
    %156 = arith.addf %154, %61 : vector<16x16xf32>
    %cst_60 = arith.constant dense<0xFF800000> : vector<16xf32>
    %157 = vector.multi_reduction <maximumf>, %155, %cst_60 [1] : vector<16x16xf32> to vector<16xf32>
    %158 = vector.shape_cast %157 : vector<16xf32> to vector<16x1xf32>
    %cst_61 = arith.constant dense<0xFF800000> : vector<16xf32>
    %159 = vector.multi_reduction <maximumf>, %156, %cst_61 [1] : vector<16x16xf32> to vector<16xf32>
    %160 = vector.shape_cast %159 : vector<16xf32> to vector<16x1xf32>
    %161 = arith.maximumf %158, %160 : vector<16x1xf32>
    %162 = vector.broadcast %161 : vector<16x1xf32> to vector<16x16xf32>
    %163 = arith.subf %155, %162 : vector<16x16xf32>
    %164 = math.exp %163 : vector<16x16xf32>
    %165 = vector.broadcast %161 : vector<16x1xf32> to vector<16x16xf32>
    %166 = arith.subf %156, %165 : vector<16x16xf32>
    %167 = math.exp %166 : vector<16x16xf32>
    %cst_62 = arith.constant dense<0.000000e+00> : vector<16xf32>
    %168 = vector.multi_reduction <add>, %164, %cst_62 [1] : vector<16x16xf32> to vector<16xf32>
    %169 = vector.shape_cast %168 : vector<16xf32> to vector<16x1xf32>
    %cst_63 = arith.constant dense<0.000000e+00> : vector<16xf32>
    %170 = vector.multi_reduction <add>, %167, %cst_63 [1] : vector<16x16xf32> to vector<16xf32>
    %171 = vector.shape_cast %170 : vector<16xf32> to vector<16x1xf32>
    %172 = arith.addf %169, %171 : vector<16x1xf32>
    %173 = tpu.reciprocal %172 {approx = true} : vector<16x1xf32> -> vector<16x1xf32>
    %174 = arith.truncf %164 : vector<16x16xf32> to vector<16x16xbf16>
    %cst_64 = arith.constant dense<0.000000e+00> : vector<16x32xf32>
    %175 = tpu.matmul %174, %144, %cst_64 {dimension_numbers = #tpu.dot_dimension_numbers<[1], [0], [0], [1], [0, 0, 1, 1], [], []>} : vector<16x16xbf16>, vector<16x32xbf16>, vector<16x32xf32> -> vector<16x32xf32>
    %176 = arith.truncf %167 : vector<16x16xf32> to vector<16x16xbf16>
    %cst_65 = arith.constant dense<0.000000e+00> : vector<16x32xf32>
    %177 = tpu.matmul %176, %146, %cst_65 {dimension_numbers = #tpu.dot_dimension_numbers<[1], [0], [0], [1], [0, 0, 1, 1], [], []>} : vector<16x16xbf16>, vector<16x32xbf16>, vector<16x32xf32> -> vector<16x32xf32>
    %178 = arith.addf %175, %177 : vector<16x32xf32>
    %179 = vector.broadcast %173 : vector<16x1xf32> to vector<16x32xf32>
    %180 = arith.mulf %178, %179 : vector<16x32xf32>
    %181 = arith.mulf %180, %42 : vector<16x32xf32>
    %182 = arith.addf %147, %181 : vector<16x32xf32>
    %183 = arith.mulf %142, %35 : vector<16x32xbf16>
    %cst_66 = arith.constant dense<0.000000e+00> : vector<16x16xf32>
    %184 = tpu.matmul %183, %143, %cst_66 {dimension_numbers = #tpu.dot_dimension_numbers<[1], [1], [0], [0], [0, 0, 1, 0], [], []>} : vector<16x32xbf16>, vector<16x32xbf16>, vector<16x16xf32> -> vector<16x16xf32>
    %cst_67 = arith.constant 2.500000e-01 : f32
    %185 = vector.broadcast %cst_67 : f32 to vector<16x16xf32>
    %186 = arith.mulf %184, %185 : vector<16x16xf32>
    %cst_68 = arith.constant dense<0.000000e+00> : vector<16x16xf32>
    %187 = tpu.matmul %183, %145, %cst_68 {dimension_numbers = #tpu.dot_dimension_numbers<[1], [1], [0], [0], [0, 0, 1, 0], [], []>} : vector<16x32xbf16>, vector<16x32xbf16>, vector<16x16xf32> -> vector<16x16xf32>
    %cst_69 = arith.constant 2.500000e-01 : f32
    %188 = vector.broadcast %cst_69 : f32 to vector<16x16xf32>
    %189 = arith.mulf %187, %188 : vector<16x16xf32>
    %190 = arith.addf %186, %55 : vector<16x16xf32>
    %191 = arith.addf %189, %61 : vector<16x16xf32>
    %cst_70 = arith.constant dense<0xFF800000> : vector<16xf32>
    %192 = vector.multi_reduction <maximumf>, %190, %cst_70 [1] : vector<16x16xf32> to vector<16xf32>
    %193 = vector.shape_cast %192 : vector<16xf32> to vector<16x1xf32>
    %cst_71 = arith.constant dense<0xFF800000> : vector<16xf32>
    %194 = vector.multi_reduction <maximumf>, %191, %cst_71 [1] : vector<16x16xf32> to vector<16xf32>
    %195 = vector.shape_cast %194 : vector<16xf32> to vector<16x1xf32>
    %196 = arith.maximumf %193, %195 : vector<16x1xf32>
    %197 = vector.broadcast %196 : vector<16x1xf32> to vector<16x16xf32>
    %198 = arith.subf %190, %197 : vector<16x16xf32>
    %199 = math.exp %198 : vector<16x16xf32>
    %200 = vector.broadcast %196 : vector<16x1xf32> to vector<16x16xf32>
    %201 = arith.subf %191, %200 : vector<16x16xf32>
    %202 = math.exp %201 : vector<16x16xf32>
    %cst_72 = arith.constant dense<0.000000e+00> : vector<16xf32>
    %203 = vector.multi_reduction <add>, %199, %cst_72 [1] : vector<16x16xf32> to vector<16xf32>
    %204 = vector.shape_cast %203 : vector<16xf32> to vector<16x1xf32>
    %cst_73 = arith.constant dense<0.000000e+00> : vector<16xf32>
    %205 = vector.multi_reduction <add>, %202, %cst_73 [1] : vector<16x16xf32> to vector<16xf32>
    %206 = vector.shape_cast %205 : vector<16xf32> to vector<16x1xf32>
    %207 = arith.addf %204, %206 : vector<16x1xf32>
    %208 = tpu.reciprocal %207 {approx = true} : vector<16x1xf32> -> vector<16x1xf32>
    %209 = arith.truncf %199 : vector<16x16xf32> to vector<16x16xbf16>
    %cst_74 = arith.constant dense<0.000000e+00> : vector<16x32xf32>
    %210 = tpu.matmul %209, %144, %cst_74 {dimension_numbers = #tpu.dot_dimension_numbers<[1], [0], [0], [1], [0, 0, 1, 1], [], []>} : vector<16x16xbf16>, vector<16x32xbf16>, vector<16x32xf32> -> vector<16x32xf32>
    %211 = arith.truncf %202 : vector<16x16xf32> to vector<16x16xbf16>
    %cst_75 = arith.constant dense<0.000000e+00> : vector<16x32xf32>
    %212 = tpu.matmul %211, %146, %cst_75 {dimension_numbers = #tpu.dot_dimension_numbers<[1], [0], [0], [1], [0, 0, 1, 1], [], []>} : vector<16x16xbf16>, vector<16x32xbf16>, vector<16x32xf32> -> vector<16x32xf32>
    %213 = arith.addf %210, %212 : vector<16x32xf32>
    %214 = vector.broadcast %208 : vector<16x1xf32> to vector<16x32xf32>
    %215 = arith.mulf %213, %214 : vector<16x32xf32>
    %216 = arith.mulf %215, %49 : vector<16x32xf32>
    %217 = arith.addf %182, %216 : vector<16x32xf32>
    %218 = arith.truncf %217 : vector<16x32xf32> to vector<16x32xbf16>
    %c0_76 = arith.constant 0 : index
    %c0_77 = arith.constant 0 : index
    %219 = vector.load %arg7[%c0_76, %c0_77] : memref<32x128xbf16, #tpu.memory_space<vmem>>, vector<32x128xbf16>
    %cst_78 = arith.constant dense<0.000000e+00> : vector<16x128xf32>
    %220 = tpu.matmul %218, %219, %cst_78 {dimension_numbers = #tpu.dot_dimension_numbers<[1], [0], [0], [1], [0, 0, 1, 1], [], []>} : vector<16x32xbf16>, vector<32x128xbf16>, vector<16x128xf32> -> vector<16x128xf32>
    %c16 = arith.constant 16 : index
    %c0_79 = arith.constant 0 : index
    %221 = vector.load %arg8[%c16, %c0_79] : memref<32x128xf32, #tpu.memory_space<vmem>>, vector<16x128xf32>
    tpu.vector_store %arg8[%c16, %c0_79], %220 {strides = array<i32>} : memref<32x128xf32, #tpu.memory_space<vmem>>, vector<16x128xf32>,
    return
  }
  func.func @transform_0(%arg0: i32) -> (i32, i32) {
    %c0_i32 = arith.constant 0 : i32
    %c0_i32_0 = arith.constant 0 : i32
    return %arg0, %c0_i32 : i32, i32
  }
  func.func @transform_1(%arg0: i32) -> (i32, i32) {
    %c0_i32 = arith.constant 0 : i32
    %c0_i32_0 = arith.constant 0 : i32
    return %arg0, %c0_i32 : i32, i32
  }
  func.func @transform_2(%arg0: i32) -> (i32, i32) {
    %c0_i32 = arith.constant 0 : i32
    %c0_i32_0 = arith.constant 0 : i32
    return %arg0, %c0_i32 : i32, i32
  }
  func.func @transform_3(%arg0: i32) -> (i32, i32) {
    %c0_i32 = arith.constant 0 : i32
    %c0_i32_0 = arith.constant 0 : i32
    %c0_i32_1 = arith.constant 0 : i32
    return %c0_i32, %c0_i32_0 : i32, i32
  }
  func.func @transform_4(%arg0: i32) -> (i32, i32) {
    %c0_i32 = arith.constant 0 : i32
    %c0_i32_0 = arith.constant 0 : i32
    %c0_i32_1 = arith.constant 0 : i32
    return %c0_i32, %c0_i32_0 : i32, i32
  }
  func.func @transform_5(%arg0: i32) -> (i32, i32) {
    %c0_i32 = arith.constant 0 : i32
    %c0_i32_0 = arith.constant 0 : i32
    %c0_i32_1 = arith.constant 0 : i32
    return %c0_i32, %c0_i32_0 : i32, i32
  }
  func.func @transform_6(%arg0: i32) -> (i32, i32) {
    %c0_i32 = arith.constant 0 : i32
    %c0_i32_0 = arith.constant 0 : i32
    %c0_i32_1 = arith.constant 0 : i32
    return %c0_i32, %c0_i32_0 : i32, i32
  }
  func.func @transform_7(%arg0: i32) -> (i32, i32) {
    %c0_i32 = arith.constant 0 : i32
    %c0_i32_0 = arith.constant 0 : i32
    return %arg0, %c0_i32 : i32, i32
  }
}

</mosaic_0001>

<bundles_post_ra>
// kernel: tpu_custom_call.1
= control target key start
LH: loop header
LB: loop body
LE: loop exit
PB: predicated region body
PF: predicated region fallthrough
CT: control target
= control target key end

     0   :  { %s2466_s0 = inlined_call_operand.vmem [shape: bf16[32,128], index: 0, kind: input, shape index: {}]   ;;  %s2467_s1 = inlined_call_operand.vmem [shape: bf16[32,128], index: 1, kind: input, shape index: {}]   ;;  %s2468_s2 = inlined_call_operand.vmem [shape: bf16[32,128], index: 2, kind: input, shape index: {}]   ;;  %s2469_s3 = inlined_call_operand.vmem [shape: bf16[128,32], index: 3, kind: input, shape index: {}]   ;;  %s2470_s4 = inlined_call_operand.vmem [shape: bf16[128,32], index: 4, kind: input, shape index: {}]   ;;  %s2471_s5 = inlined_call_operand.vmem [shape: bf16[128,32], index: 5, kind: input, shape index: {}]   ;;  %s2472_s6 = inlined_call_operand.vmem [shape: bf16[32,128], index: 6, kind: input, shape index: {}]   ;;  %s2473_s7 = inlined_call_operand.hbm [shape: f32[32,128], index: 7, kind: output, shape index: {}]  }
   0x1   :  { %v1983_v0 = vld [vmem:[%s2470_s4 + $0x38] sm:$0xff]   ;;  %v1984_v1 = vld [vmem:[%s2470_s4 + $0x30] sm:$0xff]   ;;  %v2142_v2 = vld [vmem:[%s2470_s4 + $0x28] sm:$0xff]  }
   0x2   :  { %1785 = vmatprep.subr.bf16.mxu1 %v1983_v0  ;;  %v1988_v3 = vld [vmem:[%s2469_s3 + $0x38] sm:$0xff]   ;;  %v1990_v4 = vld [vmem:[%s2469_s3 + $0x30] sm:$0xff]   ;;  %v1986_v5 = vld [vmem:[%s2470_s4 + $0x20] sm:$0xff]  }
   0x3   :  { %1786 = vmatpush3.bf16.msra.mxu1 %v1983_v0  ;;  %1765 = vmatprep.subr.bf16.mxu0 %v1988_v3  ;;  %v1992_v6 = vld [vmem:[%s2469_s3 + $0x28] sm:$0xff]   ;;  %v1987_v7 = vld [vmem:[%s2470_s4 + $0x18] sm:$0xff]   ;;  %v1995_v8 = vld [vmem:[%s2466_s0] sm:$0xff]  }
   0x4   :  { %1787 = vmatprep.subr.bf16.mxu1 %v1984_v1  ;;  %1766 = vmatpush3.bf16.msra.mxu0 %v1988_v3  ;;  %v1994_v9 = vld [vmem:[%s2469_s3 + $0x20] sm:$0xff]   ;;  %v1989_v10 = vld [vmem:[%s2470_s4 + $0x10] sm:$0xff]   ;;  %v1997_v11 = vld [vmem:[%s2469_s3 + $0x18] sm:$0xff]  }
   0x5   :  { %1767 = vmatprep.subr.bf16.mxu0 %v1990_v4  ;;  %1801 = vmatprep.mubr.bf16.mxu1 %v1995_v8  ;;  %v1991_v12 = vld [vmem:[%s2470_s4 + $0x8] sm:$0xff]   ;;  %v1998_v13 = vld [vmem:[%s2469_s3 + $0x10] sm:$0xff]   ;;  %v1993_v14 = vld [vmem:[%s2470_s4] sm:$0xff]  }
   0x6   :  { %1781 = vmatprep.mubr.bf16.mxu0 %v1995_v8  ;;  %v1999_v15 = vld [vmem:[%s2469_s3 + $0x8] sm:$0xff]   ;;  %v2000_v16 = vld [vmem:[%s2469_s3] sm:$0xff]  }
   0x7   :  { %1788 = vmatpush3.bf16.msra.mxu1 %v1984_v1  ;;  %v1996_v17 = vld [vmem:[%s2466_s0 + $0x8] sm:$0xff]   ;;  %v2001_v18 = vld [vmem:[%s2467_s1] sm:$0xff]  }
   0x8   :  { %1789 = vmatprep.subr.bf16.mxu1 %v2142_v2  ;;  %1768 = vmatpush3.bf16.msra.mxu0 %v1990_v4 }
   0x9   :  { %1769 = vmatprep.subr.bf16.mxu0 %v1992_v6 }
   0xb   :  { %1790 = vmatpush3.bf16.msra.mxu1 %v2142_v2 }
   0xc   :  { %1791 = vmatprep.subr.bf16.mxu1 %v1986_v5  ;;  %1770 = vmatpush3.bf16.msra.mxu0 %v1992_v6 }
   0xd   :  { %1771 = vmatprep.subr.bf16.mxu0 %v1994_v9 }
   0xf   :  { %1792 = vmatpush3.bf16.msra.mxu1 %v1986_v5 }
  0x10   :  { %1793 = vmatprep.subr.bf16.mxu1 %v1987_v7  ;;  %1772 = vmatpush3.bf16.msra.mxu0 %v1994_v9 }
  0x11   :  { %1773 = vmatprep.subr.bf16.mxu0 %v1997_v11 }
  0x13   :  { %1794 = vmatpush3.bf16.msra.mxu1 %v1987_v7 }
  0x14   :  { %1795 = vmatprep.subr.bf16.mxu1 %v1989_v10  ;;  %1774 = vmatpush3.bf16.msra.mxu0 %v1997_v11 }
  0x15   :  { %1775 = vmatprep.subr.bf16.mxu0 %v1998_v13 }
  0x17   :  { %1796 = vmatpush3.bf16.msra.mxu1 %v1989_v10 }
  0x18   :  { %1797 = vmatprep.subr.bf16.mxu1 %v1991_v12  ;;  %1776 = vmatpush3.bf16.msra.mxu0 %v1998_v13 }
  0x19   :  { %1777 = vmatprep.subr.bf16.mxu0 %v1999_v15 }
  0x1b   :  { %1798 = vmatpush3.bf16.msra.mxu1 %v1991_v12 }
  0x1c   :  { %1799 = vmatprep.subr.bf16.mxu1 %v1993_v14  ;;  %1778 = vmatpush3.bf16.msra.mxu0 %v1999_v15 }
  0x1f   :  { %1800 = vmatpush3.bf16.msra.mxu1 %v1993_v14 }
  0x20   :  { %1825 = vmatprep.subr.bf16.mxu1 %v1983_v0 }
  0x21   :  { %12 = vsyncpa [#allocation3], 0  ;;  %1779 = vmatprep.subr.bf16.mxu0 %v2000_v16  ;;  %v2003_v19 = vld [vmem:[%s2471_s5 + $0x38] sm:$0xff]   ;;  %v2004_v20 = vld [vmem:[%s2471_s5 + $0x30] sm:$0xff]   ;;  %v2087_v30 = vmov 0.0   ;;  %vm2088_vm0 = vmmov 0   ;;  %v523_v31 = vlaneseq }
  0x22   :  { %1802 = vmatmul.mubr.bf16.vlgmr.msra.gmra.mxu1 %v1996_v17  ;;  %1780 = vmatpush3.bf16.msra.mxu0 %v2000_v16  ;;  %v2005_v21 = vld [vmem:[%s2471_s5 + $0x28] sm:$0xff]   ;;  %v2006_v22 = vld [vmem:[%s2471_s5 + $0x20] sm:$0xff]   ;;  %v2007_v23 = vld [vmem:[%s2471_s5 + $0x18] sm:$0xff]   ;;  %vm540_vm5 = vcmask 261120   ;;  %v2089_v9 = vmov -1e+30  }
  0x23   :  { %1826 = vmatpush3.bf16.msra.mxu1 %v1983_v0  ;;  %1841 = vmatprep.mubr.bf16.mxu1 %v2001_v18  ;;  %v2008_v24 = vld [vmem:[%s2471_s5 + $0x10] sm:$0xff]   ;;  %v2009_v25 = vld [vmem:[%s2471_s5 + $0x8] sm:$0xff]   ;;  %v2010_v26 = vld [vmem:[%s2471_s5] sm:$0xff]   ;;  %v2235_v32 = vand.u32 127, %v523_v31  ;;  %vm640_vm7 = vcmask 130048  }
  0x24   :  { %1827 = vmatprep.subr.bf16.mxu1 %v1984_v1  ;;  %1805 = vmatprep.subr.bf16.mxu0 %v2003_v19  ;;  %v2002_v27 = vld [vmem:[%s2467_s1 + $0x8] sm:$0xff]   ;;  %v2011_v28 = vld [vmem:[%s2468_s2] sm:$0xff]  }
  0x25   :  { %1782 = vmatmul.mubr.bf16.vlgmr.msra.gmra.mxu0 %v1996_v17  ;;  %v2012_v29 = vld [vmem:[%s2468_s2 + $0x8] sm:$0xff]   ;;  %vm531_vm1 = vcmp.ge.s32.totalorder %v2235_v32, 16  ;;  %vm532_vm2 = vcmp.lt.s32.totalorder %v2235_v32, 32  ;;  %vm526_vm3 = vcmp.lt.s32.totalorder %v2235_v32, 16  ;;  %vm537_vm6 = vcmp.lt.s32.totalorder %v2235_v32, 8 }
  0x26   :  { %1806 = vmatpush3.bf16.msra.mxu0 %v2003_v19  ;;  %1821 = vmatprep.mubr.bf16.mxu0 %v1995_v8  ;;  %vm533_vm4 = vmand %vm531_vm1, %vm532_vm2  ;;  %v2247_v41 = vsel %vm526_vm3, 1.0, %v2087_v30 }
  0x27   :  { %1828 = vmatpush3.bf16.msra.mxu1 %v1984_v1  ;;  %1807 = vmatprep.subr.bf16.mxu0 %v2004_v20  ;;  %v2250_v42 = vsel %vm533_vm4, 1.0, %v2087_v30  ;;  %v530_v46 = vpack.c.bf16 %v2247_v41, %v2247_v41 }
  0x28   :  { %1829 = vmatprep.subr.bf16.mxu1 %v2142_v2  ;;  %v536_v47 = vpack.c.bf16 %v2250_v42, %v2250_v42 }
  0x2a   :  { %1808 = vmatpush3.bf16.msra.mxu0 %v2004_v20 }
  0x2b   :  { %1830 = vmatpush3.bf16.msra.mxu1 %v2142_v2  ;;  %1809 = vmatprep.subr.bf16.mxu0 %v2005_v21 }
  0x2c   :  { %1831 = vmatprep.subr.bf16.mxu1 %v1986_v5 }
  0x2e   :  { %1810 = vmatpush3.bf16.msra.mxu0 %v2005_v21 }
  0x2f   :  { %1832 = vmatpush3.bf16.msra.mxu1 %v1986_v5  ;;  %1811 = vmatprep.subr.bf16.mxu0 %v2006_v22 }
  0x30   :  { %1833 = vmatprep.subr.bf16.mxu1 %v1987_v7 }
  0x32   :  { %1812 = vmatpush3.bf16.msra.mxu0 %v2006_v22 }
  0x33   :  { %1834 = vmatpush3.bf16.msra.mxu1 %v1987_v7  ;;  %1813 = vmatprep.subr.bf16.mxu0 %v2007_v23 }
  0x34   :  { %1835 = vmatprep.subr.bf16.mxu1 %v1989_v10 }
  0x36   :  { %1814 = vmatpush3.bf16.msra.mxu0 %v2007_v23 }
  0x37   :  { %1836 = vmatpush3.bf16.msra.mxu1 %v1989_v10  ;;  %1815 = vmatprep.subr.bf16.mxu0 %v2008_v24  ;;  %v2295_v10 = vsel %vm537_vm6, 0.0, %v2089_v9 }
  0x38   :  { %1837 = vmatprep.subr.bf16.mxu1 %v1991_v12 }
  0x3a   :  { %1816 = vmatpush3.bf16.msra.mxu0 %v2008_v24 }
  0x3b   :  { %1838 = vmatpush3.bf16.msra.mxu1 %v1991_v12  ;;  %1817 = vmatprep.subr.bf16.mxu0 %v2009_v25 }
  0x3c   :  { %1839 = vmatprep.subr.bf16.mxu1 %v1993_v14 }
  0x3e   :  { %1818 = vmatpush3.bf16.msra.mxu0 %v2009_v25 }
  0x3f   :  { %1840 = vmatpush3.bf16.msra.mxu1 %v1993_v14  ;;  %1819 = vmatprep.subr.bf16.mxu0 %v2010_v26 }
  0x40   :  { %1865 = vmatprep.subr.bf16.mxu1 %v2087_v30 }
  0x42   :  { %1842 = vmatmul.mubr.bf16.vlgmr.msra.gmra.mxu1 %v2002_v27  ;;  %1820 = vmatpush3.bf16.msra.mxu0 %v2010_v26 }
  0x43   :  { %1845 = vmatprep.subr.bf16.mxu0 %v2003_v19  ;;  %1867 = vmatprep.mubr.msk.bf16.mxu1 %vm2088_vm0, %v2087_v30 }
  0x45   :  { %1822 = vmatmul.mubr.bf16.vlgmr.msra.gmra.mxu0 %v1996_v17 }
  0x46   :  { %1846 = vmatpush3.bf16.msra.mxu0 %v2003_v19  ;;  %1861 = vmatprep.mubr.bf16.mxu0 %v2011_v28 }
  0x47   :  { %1847 = vmatprep.subr.bf16.mxu0 %v2004_v20 }
  0x4a   :  { %1848 = vmatpush3.bf16.msra.mxu0 %v2004_v20 }
  0x4b   :  { %1849 = vmatprep.subr.bf16.mxu0 %v2005_v21 }
  0x4e   :  { %1850 = vmatpush3.bf16.msra.mxu0 %v2005_v21 }
  0x4f   :  { %1851 = vmatprep.subr.bf16.mxu0 %v2006_v22 }
  0x52   :  { %1852 = vmatpush3.bf16.msra.mxu0 %v2006_v22 }
  0x53   :  { %1853 = vmatprep.subr.bf16.mxu0 %v2007_v23 }
  0x56   :  { %1854 = vmatpush3.bf16.msra.mxu0 %v2007_v23 }
  0x57   :  { %1855 = vmatprep.subr.bf16.mxu0 %v2008_v24 }
  0x5a   :  { %1856 = vmatpush3.bf16.msra.mxu0 %v2008_v24 }
  0x5b   :  { %1857 = vmatprep.subr.bf16.mxu0 %v2009_v25 }
  0x5e   :  { %1858 = vmatpush3.bf16.msra.mxu0 %v2009_v25 }
  0x5f   :  { %1859 = vmatprep.subr.bf16.mxu0 %v2010_v26 }
  0x62   :  { %1860 = vmatpush3.bf16.msra.mxu0 %v2010_v26 }
  0x63   :  { %1889 = vmatprep.subr.bf16.mxu0 %v2087_v30 }
  0x65   :  { %1862 = vmatmul.mubr.bf16.vlgmr.msra.gmra.mxu0 %v2012_v29 }
  0x66   :  { %1891 = vmatprep.mubr.msk.bf16.mxu0 %vm2088_vm0, %v2087_v30 }
  0xe2   :  { %v2237_v33 = vpop.f32.mrf.mxu1 }
  0xe4   :  { %v265_v34 = vpop.f32.mrf.mxu1 }
  0xe5   :  { %v1783_v37 = vpop.f32.mrf.mxu0 }
  0xe6   :  { %v2241_v35 = vpop.f32.mrf.mxu1 }
  0xe7   :  { %v281_v36 = vpack.c.bf16 %v2241_v35, %v2237_v33  ;;  %v150_v40 = vpop.f32.mrf.mxu0  ;;  %v2013_v33 = vld [vmem:[%s2472_s6 + $0x8] sm:$0xff]   ;;  %v2014_v35 = vld [vmem:[%s2472_s6] sm:$0xff]  }
  0xe8   :  { %v268_v38 = vpop.f32.mrf.mxu1 }
  0xe9   :  { %v280_v39 = vpack.c.bf16 %v268_v38, %v265_v34  ;;  %v1784_v44 = vpop.f32.mrf.mxu0 }
  0xea   :  { %v166_v45 = vpack.c.bf16 %v1784_v44, %v1783_v37 }
  0xeb   :  { %v545_v43 = vsel %vm540_vm5, %v280_v39, 0  ;;  %v153_v48 = vpop.f32.mrf.mxu0 }
  0xec   :  { %1866 = vmatpush3.bf16.xpose.msra.mxu1 %v545_v43  ;;  %1890 = vmatpush3.bf16.xpose.msra.mxu0 %v545_v43  ;;  %v2259_v49 = vmul.bf16 %v530_v46, %v166_v45  ;;  %v2261_v50 = vmul.bf16 %v536_v47, %v166_v45  ;;  %v165_v51 = vpack.c.bf16 %v153_v48, %v150_v40 }
  0xed   :  { %1871 = vmatprep.subr.bf16.mxu1 %v2087_v30  ;;  %1901 = vmatprep.subr.bf16.mxu0 %v2087_v30 }
  0xee   :  { %v539_v52 = vmul.bf16 %v530_v46, %v165_v51  ;;  %v2263_v53 = vmul.bf16 %v536_v47, %v165_v51 }
  0xf3   :  { %1868 = vmatmul.mubr.msk.bf16.vlgmr.msra.gmra.mxu1 %vm540_vm5, %v539_v52  ;;  %1892 = vmatmul.mubr.msk.bf16.vlgmr.msra.gmra.mxu0 %vm540_vm5, %v2263_v53 }
  0xf4   :  { %1873 = vmatprep.mubr.msk.bf16.mxu1 %vm2088_vm0, %v2087_v30  ;;  %1903 = vmatprep.mubr.msk.bf16.mxu0 %vm2088_vm0, %v2087_v30 }
 0x102   :  { %v2272_v54 = vpop.f32.mrf.mxu1 }
 0x104   :  { %v443_v55 = vpop.f32.mrf.mxu1 }
 0x105   :  { %v1823_v58 = vpop.f32.mrf.mxu0 }
 0x106   :  { %v2274_v56 = vpop.f32.mrf.mxu1 }
 0x107   :  { %v459_v57 = vpack.c.bf16 %v2274_v56, %v2272_v54  ;;  %v380_v61 = vpop.f32.mrf.mxu0 }
 0x108   :  { %v446_v59 = vpop.f32.mrf.mxu1 }
 0x109   :  { %v458_v60 = vpack.c.bf16 %v446_v59, %v443_v55  ;;  %v1824_v63 = vpop.f32.mrf.mxu0 }
 0x10a   :  { %v2282_v0 = vpack.c.bf16 %v1824_v63, %v1823_v58 }
 0x10b   :  { %v2279_v62 = vsel %vm540_vm5, %v458_v60, 0  ;;  %v383_v1 = vpop.f32.mrf.mxu0 }
 0x10c   :  { %1872 = vmatpush3.bf16.xpose.msra.mxu1 %v2279_v62  ;;  %v2285_v2 = vpack.c.bf16 %v383_v1, %v380_v61 }
 0x10d   :  { %1877 = vmatprep.subr.bf16.mxu1 %v2087_v30 }
 0x113   :  { %1874 = vmatmul.mubr.msk.bf16.vlgmr.msra.gmra.mxu1 %vm540_vm5, %v539_v52 }
 0x114   :  { %1879 = vmatprep.mubr.msk.bf16.mxu1 %vm2088_vm0, %v2087_v30 }
 0x125   :  { %v1863_v3 = vpop.f32.mrf.mxu0 }
 0x127   :  { %v506_v4 = vpop.f32.mrf.mxu0 }
 0x129   :  { %v1864_v5 = vpop.f32.mrf.mxu0 }
 0x12a   :  { %v2290_v6 = vpack.c.bf16 %v1864_v5, %v1863_v3 }
 0x12b   :  { %v509_v7 = vpop.f32.mrf.mxu0 }
 0x12c   :  { %v521_v8 = vpack.c.bf16 %v509_v7, %v506_v4 }
 0x12e   :  { %1878 = vmatpush3.bf16.msra.mxu1 %v521_v8  ;;  %1902 = vmatpush3.bf16.msra.mxu0 %v521_v8 }
 0x12f   :  { %1883 = vmatprep.subr.bf16.mxu1 %v2087_v30  ;;  %1913 = vmatprep.subr.bf16.mxu0 %v2087_v30 }
 0x1b3   :  { %v581_v11 = vpop.f32.mrf.mxu1  ;;  %v817_v12 = vpop.f32.mrf.mxu0 }
 0x1b4   :  { %v588_v13 = vmul.f32 0.25, %v581_v11  ;;  %v824_v16 = vmul.f32 0.25, %v817_v12 }
 0x1b5   :  { %v1869_v14 = vpop.f32.mrf.mxu1  ;;  %v1893_v15 = vpop.f32.mrf.mxu0 }
 0x1b6   :  { %v636_v17 = vadd.f32 %v588_v13, %v2295_v10  ;;  %v2301_v25 = vadd.f32 %v824_v16, %v2295_v10 }
 0x1b7   :  { %v584_v18 = vpop.f32.mrf.mxu1  ;;  %v820_v19 = vpop.f32.mrf.mxu0 }
 0x1b8   :  { %v589_v20 = vmul.f32 0.25, %v584_v18  ;;  %v641_v21 = vsel %vm640_vm7, %v636_v17, -inf  ;;  %v873_v27 = vsel %vm640_vm7, %v2301_v25, -inf  ;;  %v825_v37 = vmul.f32 0.25, %v820_v19 }
 0x1b9   :  { %642 = vmax.xlane.f32.xlu0 %v641_v21  ;;  %v1870_v22 = vpop.f32.mrf.mxu1  ;;  %v1894_v23 = vpop.f32.mrf.mxu0 }
 0x1ba   :  { %v637_v24 = vadd.f32 %v589_v20, %v2295_v10  ;;  %v2311_v45 = vadd.f32 %v825_v37, %v2295_v10 }
 0x1bc   :  { %v644_v26 = vsel %vm640_vm7, %v637_v24, -inf  ;;  %v876_v46 = vsel %vm640_vm7, %v2311_v45, -inf }
 0x1bd   :  { %645 = vmax.xlane.f32.xlu0 %v644_v26 }
 0x1c1   :  { %874 = vmax.xlane.f32.xlu0 %v873_v27 }
 0x1d3   :  { %v627_v28 = vpop.f32.mrf.mxu1 }
 0x1d4   :  { %v634_v29 = vmul.f32 0.25, %v627_v28 }
 0x1d5   :  { %v1875_v31 = vpop.f32.mrf.mxu1 }
 0x1d6   :  { %v638_v32 = vadd.f32 %v634_v29, %v2295_v10 }
 0x1d7   :  { %v630_v34 = vpop.f32.mrf.mxu1 }
 0x1d8   :  { %v635_v38 = vmul.f32 0.25, %v630_v34  ;;  %v647_v39 = vsel %vm640_vm7, %v638_v32, -inf }
 0x1d9   :  { %648 = vmax.xlane.f32.xlu1 %v647_v39  ;;  %v1876_v40 = vpop.f32.mrf.mxu1 }
 0x1da   :  { %v639_v43 = vadd.f32 %v635_v38, %v2295_v10 }
 0x1dc   :  { %v650_v44 = vsel %vm640_vm7, %v639_v43, -inf }
 0x1dd   :  { %651 = vmax.xlane.f32.xlu1 %v650_v44 }
 0x1e1   :  { %877 = vmax.xlane.f32.xlu1 %v876_v46 }
 0x242   :  { %v643_v47 = vpop.xlane.xlu0 %642 }
 0x246   :  { %v646_v55 = vpop.xlane.xlu0 %645 }
 0x24a   :  { %v875_v40 = vpop.xlane.xlu0 %874 }
 0x262   :  { %v649_v48 = vpop.xlane.xlu1 %648 }
 0x263   :  { %v653_v51 = vmax.f32 %v643_v47, %v649_v48 }
 0x265   :  { %v661_v52 = vsub.f32 %v638_v32, %v653_v51  ;;  %v655_v3 = vsub.f32 %v636_v17, %v653_v51 }
 0x266   :  { %v652_v58 = vpop.xlane.xlu1 %651 }
 0x267   :  { %v654_v59 = vmax.f32 %v646_v55, %v652_v58  ;;  %v663_v60 = vmul.f32 1.442695, %v661_v52  ;;  %v657_v5 = vmul.f32 1.442695, %v655_v3 }
 0x269   :  { %v662_v61 = vsub.f32 %v639_v43, %v654_v59  ;;  %v656_v1 = vsub.f32 %v637_v24, %v654_v59  ;;  %2017 = vpow2.f32 %v663_v60 }
 0x26a   :  { %v878_v43 = vpop.xlane.xlu1 %877 }
 0x26b   :  { %v665_v63 = vmul.f32 1.442695, %v662_v61  ;;  %v659_v4 = vmul.f32 1.442695, %v656_v1 }
 0x26d   :  { %2019 = vpow2.f32 %v665_v63 }
 0x26e   :  { %2021 = vpow2.f32 %v659_v4 }
 0x26f   :  { %2023 = vpow2.f32 %v657_v5 }
 0x276   :  { %v2018_v7 = vpop.eup %2017 }
 0x277   :  { %v673_v37 = vsel %vm640_vm7, %v2018_v7, 0.0 }
 0x27a   :  { %v2020_v8 = vpop.eup %2019 }
 0x27b   :  { %v684_v9 = vpack.c.bf16 %v2020_v8, %v2018_v7  ;;  %v2022_v11 = vpop.eup %2021  ;;  %v676_v39 = vsel %vm640_vm7, %v2020_v8, 0.0 }
 0x27c   :  { %v2024_v12 = vpop.eup %2023  ;;  %v670_v38 = vsel %vm640_vm7, %v2022_v11, 0.0 }
 0x27d   :  { %1880 = vmatmul.mubr.msk.bf16.vlgmr.msra.gmra.mxu1 %vm640_vm7, %v684_v9  ;;  %v683_v13 = vpack.c.bf16 %v2022_v11, %v2024_v12  ;;  %v667_v32 = vsel %vm640_vm7, %v2024_v12, 0.0  ;;  %v2352_v11 = vsel %vm540_vm5, %v281_v36, 0 }
 0x27e   :  { %1884 = vmatpush3.bf16.msra.mxu1 %v2285_v2  ;;  %1885 = vmatprep.mubr.msk.bf16.mxu1 %vm2088_vm0, %v2087_v30 }
 0x27f   :  { %1895 = vmatprep.subr.bf16.mxu1 %v2087_v30 }
 0x285   :  { %1886 = vmatmul.mubr.msk.bf16.vlgmr.msra.gmra.mxu1 %vm640_vm7, %v683_v13 }
 0x286   :  { %1896 = vmatpush3.bf16.xpose.msra.mxu1 %v2279_v62  ;;  %1897 = vmatprep.mubr.msk.bf16.mxu1 %vm2088_vm0, %v2087_v30 }
 0x287   :  { %1907 = vmatprep.subr.bf16.mxu1 %v2087_v30 }
 0x28d   :  { %1898 = vmatmul.mubr.msk.bf16.vlgmr.msra.gmra.mxu1 %vm540_vm5, %v2263_v53 }
 0x28e   :  { %1908 = vmatpush3.bf16.msra.mxu1 %v2285_v2  ;;  %1909 = vmatprep.mubr.msk.bf16.mxu1 %vm2088_vm0, %v2087_v30 }
 0x28f   :  { %1921 = vmatprep.subr.bf16.mxu1 %v2087_v30 }
 0x33d   :  { %v722_v14 = vpop.f32.mrf.mxu1 }
 0x33f   :  { %v1881_v15 = vpop.f32.mrf.mxu1 }
 0x341   :  { %v725_v16 = vpop.f32.mrf.mxu1 }
 0x343   :  { %v1882_v17 = vpop.f32.mrf.mxu1 }
 0x345   :  { %v766_v62 = vpop.f32.mrf.mxu1 }
 0x346   :  { %v2331_v18 = vadd.f32 %v766_v62, %v722_v14 }
 0x347   :  { %v1887_v19 = vpop.f32.mrf.mxu1 }
 0x349   :  { %v769_v20 = vpop.f32.mrf.mxu1 }
 0x34a   :  { %v2333_v21 = vadd.f32 %v769_v20, %v725_v16 }
 0x34b   :  { %v1888_v22 = vpop.f32.mrf.mxu1 }
 0x34d   :  { %v860_v53 = vpop.f32.mrf.mxu1 }
 0x34e   :  { %v867_v23 = vmul.f32 0.25, %v860_v53 }
 0x34f   :  { %v1899_v2 = vpop.f32.mrf.mxu1 }
 0x350   :  { %v871_v24 = vadd.f32 %v867_v23, %v2295_v10 }
 0x351   :  { %v863_v26 = vpop.f32.mrf.mxu1 }
 0x352   :  { %v868_v27 = vmul.f32 0.25, %v863_v26  ;;  %v879_v28 = vsel %vm640_vm7, %v871_v24, -inf }
 0x353   :  { %880 = vmax.xlane.f32.xlu0 %v879_v28  ;;  %v1900_v29 = vpop.f32.mrf.mxu1 }
 0x354   :  { %v872_v31 = vadd.f32 %v868_v27, %v2295_v10 }
 0x356   :  { %v882_v34 = vsel %vm640_vm7, %v872_v31, -inf }
 0x357   :  { %668 = vadd.xlane.f32.xlu0 %v667_v32  ;;  %883 = vmax.xlane.f32.xlu1 %v882_v34 }
 0x35b   :  { %674 = vadd.xlane.f32.xlu0 %v673_v37  ;;  %671 = vadd.xlane.f32.xlu1 %v670_v38 }
 0x35f   :  { %677 = vadd.xlane.f32.xlu1 %v676_v39 }
 0x3dc   :  { %v881_v44 = vpop.xlane.xlu0 %880 }
 0x3dd   :  { %v885_v46 = vmax.f32 %v875_v40, %v881_v44 }
 0x3df   :  { %v887_v47 = vsub.f32 %v2301_v25, %v885_v46  ;;  %v893_v48 = vsub.f32 %v871_v24, %v885_v46 }
 0x3e0   :  { %v884_v51 = vpop.xlane.xlu1 %883  ;;  %v669_v36 = vpop.xlane.xlu0 %668 }
 0x3e1   :  { %v889_v52 = vmul.f32 1.442695, %v887_v47  ;;  %v895_v55 = vmul.f32 1.442695, %v893_v48  ;;  %v886_v58 = vmax.f32 %v878_v43, %v884_v51 }
 0x3e3   :  { %2025 = vpow2.f32 %v889_v52  ;;  %v888_v59 = vsub.f32 %v2311_v45, %v886_v58  ;;  %v894_v60 = vsub.f32 %v872_v31, %v886_v58 }
 0x3e4   :  { %2027 = vpow2.f32 %v895_v55  ;;  %v672_v13 = vpop.xlane.xlu1 %671  ;;  %v675_v14 = vpop.xlane.xlu0 %674 }
 0x3e5   :  { %v891_v61 = vmul.f32 1.442695, %v888_v59  ;;  %v897_v63 = vmul.f32 1.442695, %v894_v60  ;;  %v679_v19 = vadd.f32 %v675_v14, %v669_v36 }
 0x3e7   :  { %2029 = vpow2.f32 %v891_v61 }
 0x3e8   :  { %2031 = vpow2.f32 %v897_v63  ;;  %v678_v15 = vpop.xlane.xlu1 %677 }
 0x3e9   :  { %v680_v20 = vadd.f32 %v678_v15, %v672_v13  ;;  %2033 = vrcp.f32 %v679_v19 }
 0x3eb   :  { %2035 = vrcp.f32 %v680_v20 }
 0x3f0   :  { %v2026_v1 = vpop.eup %2025 }
 0x3f1   :  { %v899_v3 = vsel %vm640_vm7, %v2026_v1, 0.0  ;;  %v2028_v4 = vpop.eup %2027 }
 0x3f2   :  { %900 = vadd.xlane.f32.xlu0 %v899_v3  ;;  %v905_v7 = vsel %vm640_vm7, %v2028_v4, 0.0 }
 0x3f4   :  { %v2030_v25 = vpop.eup %2029 }
 0x3f5   :  { %v2032_v5 = vpop.eup %2031  ;;  %v902_v8 = vsel %vm640_vm7, %v2030_v25, 0.0  ;;  %v915_v9 = vpack.c.bf16 %v2030_v25, %v2026_v1 }
 0x3f6   :  { %906 = vadd.xlane.f32.xlu0 %v905_v7  ;;  %903 = vadd.xlane.f32.xlu1 %v902_v8  ;;  %v916_v45 = vpack.c.bf16 %v2032_v5, %v2028_v4  ;;  %v908_v12 = vsel %vm640_vm7, %v2032_v5, 0.0  ;;  %v2034_v24 = vpop.eup %2033  ;;  %v1125_v8 = vsel %vm540_vm5, %v459_v57, 0 }
 0x3f7   :  { %1910 = vmatmul.mubr.msk.bf16.vlgmr.msra.gmra.mxu1 %vm640_vm7, %v915_v9  ;;  %v773_v39 = vmul.f32 %v2034_v24, %v2331_v18 }
 0x3f8   :  { %1904 = vmatmul.mubr.msk.bf16.vlgmr.msra.gmra.mxu0 %vm640_vm7, %v916_v45  ;;  %1922 = vmatpush3.bf16.xpose.msra.mxu1 %v2352_v11  ;;  %v2036_v27 = vpop.eup %2035 }
 0x3f9   :  { %1923 = vmatprep.mubr.msk.bf16.mxu1 %vm2088_vm0, %v2087_v30  ;;  %1933 = vmatprep.subr.bf16.mxu1 %v2087_v30  ;;  %v774_v40 = vmul.f32 %v2036_v27, %v2333_v21  ;;  %v775_v58 = vmul.f32 %v2247_v41, %v773_v39 }
 0x3fa   :  { %909 = vadd.xlane.f32.xlu1 %v908_v12  ;;  %1917 = vmatprep.mubr.msk.bf16.mxu0 %vm2088_vm0, %v2087_v30 }
 0x3fb   :  { %1914 = vmatpush3.bf16.msra.mxu0 %v2013_v33  ;;  %v776_v59 = vmul.f32 %v2247_v41, %v774_v40 }
 0x3fc   :  { %1915 = vmatprep.subr.bf16.mxu0 %v2087_v30 }
 0x3ff   :  { %1924 = vmatmul.mubr.msk.bf16.vlgmr.msra.gmra.mxu1 %vm540_vm5, %v2259_v49  ;;  %1916 = vmatpush3.bf16.msra.mxu0 %v2014_v35 }
 0x400   :  { %1934 = vmatpush3.bf16.msra.mxu1 %v2290_v6  ;;  %1935 = vmatprep.mubr.msk.bf16.mxu1 %vm2088_vm0, %v2087_v30 }
 0x401   :  { %1945 = vmatprep.subr.bf16.mxu1 %v2087_v30  ;;  %1927 = vmatprep.subr.bf16.mxu0 %v2087_v30 }
 0x47b   :  { %v901_v16 = vpop.xlane.xlu0 %900 }
 0x47f   :  { %v904_v17 = vpop.xlane.xlu1 %903  ;;  %v907_v62 = vpop.xlane.xlu0 %906 }
 0x480   :  { %v911_v22 = vadd.f32 %v907_v62, %v901_v16 }
 0x482   :  { %2037 = vrcp.f32 %v911_v22 }
 0x483   :  { %v910_v53 = vpop.xlane.xlu1 %909 }
 0x484   :  { %v912_v23 = vadd.f32 %v910_v53, %v904_v17 }
 0x486   :  { %2039 = vrcp.f32 %v912_v23 }
 0x48f   :  { %v2038_v31 = vpop.eup %2037 }
 0x493   :  { %v2040_v46 = vpop.eup %2039 }
 0x4b7   :  { %v998_v2 = vpop.f32.mrf.mxu1 }
 0x4b8   :  { %v954_v26 = vpop.f32.mrf.mxu0 }
 0x4b9   :  { %v999_v28 = vadd.f32 %v998_v2, %v954_v26  ;;  %v1911_v29 = vpop.f32.mrf.mxu1 }
 0x4ba   :  { %v1905_v32 = vpop.f32.mrf.mxu0 }
 0x4bb   :  { %v1005_v34 = vmul.f32 %v2038_v31, %v999_v28  ;;  %v1001_v37 = vpop.f32.mrf.mxu1 }
 0x4bc   :  { %v957_v38 = vpop.f32.mrf.mxu0 }
 0x4bd   :  { %v1002_v43 = vadd.f32 %v1001_v37, %v957_v38  ;;  %v1912_v44 = vpop.f32.mrf.mxu1  ;;  %v1007_v48 = vmul.f32 %v2250_v42, %v1005_v34 }
 0x4be   :  { %v1906_v47 = vpop.f32.mrf.mxu0 }
 0x4bf   :  { %v1006_v51 = vmul.f32 %v2040_v46, %v1002_v43  ;;  %v1115_v52 = vpop.f32.mrf.mxu1  ;;  %v1009_v63 = vadd.f32 %v1007_v48, %v775_v58 }
 0x4c0   :  { %v1122_v55 = vmul.f32 0.25, %v1115_v52 }
 0x4c1   :  { %v1008_v60 = vmul.f32 %v2250_v42, %v1006_v51  ;;  %v1925_v61 = vpop.f32.mrf.mxu1 }
 0x4c2   :  { %v1170_v18 = vadd.f32 %v1122_v55, %v2295_v10 }
 0x4c3   :  { %v1010_v21 = vadd.f32 %v1008_v60, %v776_v59  ;;  %v1118_v1 = vpop.f32.mrf.mxu1 }
 0x4c4   :  { %v1123_v3 = vmul.f32 0.25, %v1118_v1  ;;  %v1174_v4 = vsel %vm640_vm7, %v1170_v18, -inf }
 0x4c5   :  { %v1011_v25 = vpack.c.bf16 %v1010_v21, %v1009_v63  ;;  %1175 = vmax.xlane.f32.xlu0 %v1174_v4  ;;  %v1926_v5 = vpop.f32.mrf.mxu1 }
 0x4c6   :  { %v1171_v7 = vadd.f32 %v1123_v3, %v2295_v10 }
 0x4c7   :  { %1918 = vmatmul.mubr.msk.bf16.vlgmr.msra.gmra.mxu0 %vm540_vm5, %v1011_v25 }
 0x4c8   :  { %1928 = vmatpush3.bf16.xpose.msra.mxu0 %v1125_v8  ;;  %v1177_v9 = vsel %vm640_vm7, %v1171_v7, -inf  ;;  %1929 = vmatprep.mubr.msk.bf16.mxu0 %vm2088_vm0, %v2087_v30 }
 0x4c9   :  { %1178 = vmax.xlane.f32.xlu1 %v1177_v9  ;;  %1939 = vmatprep.subr.bf16.mxu0 %v2087_v30 }
 0x4cf   :  { %1930 = vmatmul.mubr.msk.bf16.vlgmr.msra.gmra.mxu0 %vm540_vm5, %v2259_v49 }
 0x4d0   :  { %1940 = vmatpush3.bf16.msra.mxu0 %v2282_v0  ;;  %1941 = vmatprep.mubr.msk.bf16.mxu0 %vm2088_vm0, %v2087_v30 }
 0x4d1   :  { %1951 = vmatprep.subr.bf16.mxu0 %v2087_v30 }
 0x54e   :  { %v1176_v62 = vpop.xlane.xlu0 %1175 }
 0x552   :  { %v1179_v19 = vpop.xlane.xlu1 %1178 }
 0x587   :  { %v1065_v54 = vpop.f32.mrf.mxu0 }
 0x588   :  { %1072 = vst [vmem:[#allocation2] sm:$0xff] %v1065_v54 }
 0x589   :  { %v1919_v56 = vpop.f32.mrf.mxu0 }
 0x58b   :  { %v1068_v57 = vpop.f32.mrf.mxu0 }
 0x58c   :  { %1073 = vst [vmem:[#allocation2 + $0x8] sm:$0xff] %v1068_v57 }
 0x58d   :  { %v1920_v45 = vpop.f32.mrf.mxu0 }
 0x58f   :  { %v1161_v12 = vpop.f32.mrf.mxu0 }
 0x590   :  { %v1168_v33 = vmul.f32 0.25, %v1161_v12 }
 0x591   :  { %v1931_v35 = vpop.f32.mrf.mxu0 }
 0x592   :  { %v1172_v36 = vadd.f32 %v1168_v33, %v2295_v10 }
 0x593   :  { %v1164_v13 = vpop.f32.mrf.mxu0 }
 0x594   :  { %v1169_v49 = vmul.f32 0.25, %v1164_v13  ;;  %v1180_v14 = vsel %vm640_vm7, %v1172_v36, -inf }
 0x595   :  { %v1932_v15 = vpop.f32.mrf.mxu0  ;;  %1181 = vmax.xlane.f32.xlu0 %v1180_v14 }
 0x596   :  { %v1173_v16 = vadd.f32 %v1169_v49, %v2295_v10 }
 0x598   :  { %v1183_v17 = vsel %vm640_vm7, %v1173_v16, -inf }
 0x599   :  { %1184 = vmax.xlane.f32.xlu1 %v1183_v17 }
 0x61e   :  { %v1182_v20 = vpop.xlane.xlu0 %1181 }
 0x61f   :  { %v1186_v22 = vmax.f32 %v1176_v62, %v1182_v20 }
 0x621   :  { %v1188_v53 = vsub.f32 %v1170_v18, %v1186_v22  ;;  %v1194_v23 = vsub.f32 %v1172_v36, %v1186_v22 }
 0x622   :  { %v1185_v2 = vpop.xlane.xlu1 %1184 }
 0x623   :  { %v1190_v24 = vmul.f32 1.442695, %v1188_v53  ;;  %v1187_v26 = vmax.f32 %v1179_v19, %v1185_v2  ;;  %v1196_v27 = vmul.f32 1.442695, %v1194_v23 }
 0x625   :  { %v1189_v28 = vsub.f32 %v1171_v7, %v1187_v26  ;;  %v1195_v29 = vsub.f32 %v1173_v16, %v1187_v26  ;;  %2041 = vpow2.f32 %v1190_v24 }
 0x626   :  { %2043 = vpow2.f32 %v1196_v27 }
 0x627   :  { %v1192_v31 = vmul.f32 1.442695, %v1189_v28  ;;  %v1198_v32 = vmul.f32 1.442695, %v1195_v29 }
 0x629   :  { %2045 = vpow2.f32 %v1192_v31 }
 0x62a   :  { %2047 = vpow2.f32 %v1198_v32 }
 0x632   :  { %v2042_v34 = vpop.eup %2041 }
 0x633   :  { %v2044_v37 = vpop.eup %2043  ;;  %v1200_v45 = vsel %vm640_vm7, %v2042_v34, 0.0 }
 0x634   :  { %v1206_v33 = vsel %vm640_vm7, %v2044_v37, 0.0 }
 0x636   :  { %v2046_v38 = vpop.eup %2045 }
 0x637   :  { %v2048_v39 = vpop.eup %2047  ;;  %v1216_v40 = vpack.c.bf16 %v2046_v38, %v2042_v34  ;;  %v1203_v35 = vsel %vm640_vm7, %v2046_v38, 0.0 }
 0x638   :  { %v1217_v43 = vpack.c.bf16 %v2048_v39, %v2044_v37  ;;  %v1209_v36 = vsel %vm640_vm7, %v2048_v39, 0.0  ;;  %v2015_v39 = vld [vmem:[%s2472_s6 + $0x8] sm:$0xff]  }
 0x639   :  { %1942 = vmatmul.mubr.msk.bf16.vlgmr.msra.gmra.mxu0 %vm640_vm7, %v1216_v40  ;;  %v2016_v40 = vld [vmem:[%s2472_s6] sm:$0xff]   ;;  %s2090_s6 = smov [#allocation2]  }
 0x63a   :  { %1936 = vmatmul.mubr.msk.bf16.vlgmr.msra.gmra.mxu1 %vm640_vm7, %v1217_v43  ;;  %1952 = vmatpush3.bf16.xpose.msra.mxu0 %v1125_v8  ;;  %s1612_s16 = sshll.u32 %s2090_s6, 4  ;;  %s1613_s16 = int_to_ptr.vmem [resolvable:$true] %s1612_s16 }
 0x63b   :  { %1946 = vmatpush3.bf16.xpose.msra.mxu1 %v2352_v11  ;;  %1947 = vmatprep.mubr.msk.bf16.mxu1 %vm2088_vm0, %v2087_v30  ;;  %s2065_s0 = scalar_lea.vmem %s1613_s16, 512  ;;  %p2070_p1 = scmp.lt.s32.totalorder %s1613_s16, %s1613_s16 }
 0x63c   :  { %1953 = vmatprep.mubr.msk.bf16.mxu0 %vm2088_vm0, %v2087_v30  ;;  %1957 = vmatprep.subr.bf16.mxu1 %v2087_v30  ;;  %p2066_p0 = scmp.ne.s32.totalorder %s1613_s16, %s2065_s0  ;;  %p2071_p2 = scmp.lt.s32.totalorder %s2065_s0, %s2065_s0 }
 0x63d   :  { %1963 = vmatprep.subr.bf16.mxu0 %v2087_v30 }
 0x63e   :  { %p2072_p3 = por %p2071_p2, %p2070_p1 }
 0x640   :  { %p2073_p4 = pnand %p2072_p3, %p2066_p0 }
 0x641   :  { %1954 = vmatmul.mubr.msk.bf16.vlgmr.msra.gmra.mxu0 %vm540_vm5, %v2261_v50 }
 0x642   :  { %1948 = vmatmul.mubr.msk.bf16.vlgmr.msra.gmra.mxu1 %vm540_vm5, %v2261_v50  ;;  %1964 = vmatpush3.bf16.msra.mxu0 %v2282_v0 }
 0x643   :  { %1958 = vmatpush3.bf16.msra.mxu1 %v2290_v6  ;;  %1959 = vmatprep.mubr.msk.bf16.mxu1 %vm2088_vm0, %v2087_v30 }
 0x644   :  { %1965 = vmatprep.mubr.msk.bf16.mxu0 %vm2088_vm0, %v2087_v30  ;;  %1969 = vmatprep.subr.bf16.mxu1 %v2087_v30 }
 0x6f9   :  { %v1299_v11 = vpop.f32.mrf.mxu0 }
 0x6fa   :  { %v1255_v44 = vpop.f32.mrf.mxu1 }
 0x6fb   :  { %v2425_v46 = vadd.f32 %v1299_v11, %v1255_v44  ;;  %v1943_v47 = vpop.f32.mrf.mxu0 }
 0x6fc   :  { %v1937_v48 = vpop.f32.mrf.mxu1 }
 0x6fd   :  { %v1302_v51 = vpop.f32.mrf.mxu0 }
 0x6fe   :  { %v1258_v50 = vpop.f32.mrf.mxu1 }
 0x6ff   :  { %v2427_v52 = vadd.f32 %v1302_v51, %v1258_v50  ;;  %v1944_v0 = vpop.f32.mrf.mxu0 }
 0x700   :  { %v1938_v6 = vpop.f32.mrf.mxu1 }
 0x701   :  { %v1393_v55 = vpop.f32.mrf.mxu0 }
 0x702   :  { %v1350_v58 = vpop.f32.mrf.mxu1  ;;  %v1400_v60 = vmul.f32 0.25, %v1393_v55 }
 0x703   :  { %v1357_v59 = vmul.f32 0.25, %v1350_v58  ;;  %v1955_v61 = vpop.f32.mrf.mxu0 }
 0x704   :  { %v1949_v18 = vpop.f32.mrf.mxu1  ;;  %v1404_v7 = vadd.f32 %v1400_v60, %v2295_v10 }
 0x705   :  { %v1396_v63 = vpop.f32.mrf.mxu0  ;;  %v1402_v21 = vadd.f32 %v1357_v59, %v2295_v10 }
 0x706   :  { %v1353_v1 = vpop.f32.mrf.mxu1  ;;  %v1401_v4 = vmul.f32 0.25, %v1396_v63  ;;  %v1412_v54 = vsel %vm640_vm7, %v1404_v7, -inf }
 0x707   :  { %v1358_v3 = vmul.f32 0.25, %v1353_v1  ;;  %v1956_v25 = vpop.f32.mrf.mxu0  ;;  %v1406_v5 = vsel %vm640_vm7, %v1402_v21, -inf }
 0x708   :  { %1407 = vmax.xlane.f32.xlu0 %v1406_v5  ;;  %v1950_v8 = vpop.f32.mrf.mxu1  ;;  %v1405_v57 = vadd.f32 %v1401_v4, %v2295_v10 }
 0x709   :  { %v1403_v9 = vadd.f32 %v1358_v3, %v2295_v10 }
 0x70a   :  { %v1415_v12 = vsel %vm640_vm7, %v1405_v57, -inf }
 0x70b   :  { %v1409_v56 = vsel %vm640_vm7, %v1403_v9, -inf }
 0x70c   :  { %1413 = vmax.xlane.f32.xlu0 %v1412_v54  ;;  %1410 = vmax.xlane.f32.xlu1 %v1409_v56 }
 0x710   :  { %1201 = vadd.xlane.f32.xlu0 %v1200_v45  ;;  %1416 = vmax.xlane.f32.xlu1 %v1415_v12 }
 0x714   :  { %1207 = vadd.xlane.f32.xlu0 %v1206_v33  ;;  %1204 = vadd.xlane.f32.xlu1 %v1203_v35 }
 0x718   :  { %1210 = vadd.xlane.f32.xlu1 %v1209_v36 }
 0x791   :  { %v1408_v13 = vpop.xlane.xlu0 %1407 }
 0x795   :  { %v1414_v49 = vpop.xlane.xlu0 %1413  ;;  %v1411_v10 = vpop.xlane.xlu1 %1410 }
 0x796   :  { %v1418_v14 = vmax.f32 %v1408_v13, %v1414_v49 }
 0x798   :  { %v1420_v15 = vsub.f32 %v1402_v21, %v1418_v14  ;;  %v1426_v16 = vsub.f32 %v1404_v7, %v1418_v14 }
 0x799   :  { %v1417_v17 = vpop.xlane.xlu1 %1416  ;;  %v1202_v43 = vpop.xlane.xlu0 %1201 }
 0x79a   :  { %v1422_v62 = vmul.f32 1.442695, %v1420_v15  ;;  %v1428_v19 = vmul.f32 1.442695, %v1426_v16  ;;  %v1419_v20 = vmax.f32 %v1411_v10, %v1417_v17 }
 0x79c   :  { %2049 = vpow2.f32 %v1422_v62  ;;  %v1421_v22 = vsub.f32 %v1403_v9, %v1419_v20  ;;  %v1427_v53 = vsub.f32 %v1405_v57, %v1419_v20 }
 0x79d   :  { %2051 = vpow2.f32 %v1428_v19  ;;  %v1205_v11 = vpop.xlane.xlu1 %1204  ;;  %v1208_v44 = vpop.xlane.xlu0 %1207 }
 0x79e   :  { %v1424_v23 = vmul.f32 1.442695, %v1421_v22  ;;  %v1430_v2 = vmul.f32 1.442695, %v1427_v53  ;;  %v1212_v0 = vadd.f32 %v1208_v44, %v1202_v43 }
 0x7a0   :  { %2053 = vpow2.f32 %v1424_v23 }
 0x7a1   :  { %2055 = vpow2.f32 %v1430_v2  ;;  %v1211_v47 = vpop.xlane.xlu1 %1210 }
 0x7a2   :  { %v1213_v6 = vadd.f32 %v1211_v47, %v1205_v11  ;;  %2057 = vrcp.f32 %v1212_v0 }
 0x7a4   :  { %2059 = vrcp.f32 %v1213_v6 }
 0x7a9   :  { %v2050_v24 = vpop.eup %2049 }
 0x7aa   :  { %v1432_v26 = vsel %vm640_vm7, %v2050_v24, 0.0  ;;  %v2052_v27 = vpop.eup %2051 }
 0x7ab   :  { %1433 = vadd.xlane.f32.xlu0 %v1432_v26  ;;  %v1438_v31 = vsel %vm640_vm7, %v2052_v27, 0.0 }
 0x7ad   :  { %v2054_v28 = vpop.eup %2053 }
 0x7ae   :  { %v2056_v29 = vpop.eup %2055  ;;  %v1435_v32 = vsel %vm640_vm7, %v2054_v28, 0.0  ;;  %v1448_v34 = vpack.c.bf16 %v2054_v28, %v2050_v24 }
 0x7af   :  { %1439 = vadd.xlane.f32.xlu0 %v1438_v31  ;;  %1436 = vadd.xlane.f32.xlu1 %v1435_v32  ;;  %v1449_v37 = vpack.c.bf16 %v2056_v29, %v2052_v27  ;;  %v1441_v38 = vsel %vm640_vm7, %v2056_v29, 0.0  ;;  %v2058_v60 = vpop.eup %2057 }
 0x7b0   :  { %1966 = vmatmul.mubr.msk.bf16.vlgmr.msra.gmra.mxu0 %vm640_vm7, %v1448_v34  ;;  %v1306_v7 = vmul.f32 %v2058_v60, %v2425_v46 }
 0x7b1   :  { %1960 = vmatmul.mubr.msk.bf16.vlgmr.msra.gmra.mxu1 %vm640_vm7, %v1449_v37  ;;  %v2060_v18 = vpop.eup %2059 }
 0x7b2   :  { %1973 = vmatprep.mubr.msk.bf16.mxu1 %vm2088_vm0, %v2087_v30  ;;  %1970 = vmatpush3.bf16.msra.mxu1 %v2015_v39  ;;  %v1307_v8 = vmul.f32 %v2060_v18, %v2427_v52  ;;  %v1308_v33 = vmul.f32 %v2247_v41, %v1306_v7 }
 0x7b3   :  { %1442 = vadd.xlane.f32.xlu1 %v1441_v38  ;;  %1971 = vmatprep.subr.bf16.mxu1 %v2087_v30 }
 0x7b4   :  { %v1309_v35 = vmul.f32 %v2247_v41, %v1307_v8 }
 0x7b6   :  { %1972 = vmatpush3.bf16.msra.mxu1 %v2016_v40 }
 0x834   :  { %v1434_v48 = vpop.xlane.xlu0 %1433 }
 0x838   :  { %v1437_v51 = vpop.xlane.xlu1 %1436  ;;  %v1440_v50 = vpop.xlane.xlu0 %1439 }
 0x839   :  { %v1444_v55 = vadd.f32 %v1440_v50, %v1434_v48 }
 0x83b   :  { %2061 = vrcp.f32 %v1444_v55 }
 0x83c   :  { %v1443_v58 = vpop.xlane.xlu1 %1442 }
 0x83d   :  { %v1445_v30 = vadd.f32 %v1443_v58, %v1437_v51 }
 0x83f   :  { %2063 = vrcp.f32 %v1445_v30 }
 0x848   :  { %v2062_v1 = vpop.eup %2061 }
 0x84c   :  { %v2064_v56 = vpop.eup %2063 }
 0x870   :  { %v1531_v59 = vpop.f32.mrf.mxu0 }
 0x871   :  { %v1487_v61 = vpop.f32.mrf.mxu1 }
 0x872   :  { %v1532_v63 = vadd.f32 %v1531_v59, %v1487_v61  ;;  %v1967_v21 = vpop.f32.mrf.mxu0 }
 0x873   :  { %v1961_v3 = vpop.f32.mrf.mxu1 }
 0x874   :  { %v1538_v4 = vmul.f32 %v2062_v1, %v1532_v63  ;;  %v1534_v25 = vpop.f32.mrf.mxu0 }
 0x875   :  { %v1490_v5 = vpop.f32.mrf.mxu1 }
 0x876   :  { %v1535_v9 = vadd.f32 %v1534_v25, %v1490_v5  ;;  %v1968_v54 = vpop.f32.mrf.mxu0  ;;  %v1540_v45 = vmul.f32 %v2250_v42, %v1538_v4 }
 0x877   :  { %v1962_v57 = vpop.f32.mrf.mxu1 }
 0x878   :  { %v1539_v12 = vmul.f32 %v2064_v56, %v1535_v9  ;;  %v1542_v13 = vadd.f32 %v1540_v45, %v1308_v33 }
 0x87a   :  { %v1541_v36 = vmul.f32 %v2250_v42, %v1539_v12 }
 0x87c   :  { %v1543_v49 = vadd.f32 %v1541_v36, %v1309_v35 }
 0x87e   :  { %v1544_v10 = vpack.c.bf16 %v1543_v49, %v1542_v13 }
 0x880   :  { %1974 = vmatmul.mubr.msk.bf16.vlgmr.msra.gmra.mxu1 %vm540_vm5, %v1544_v10 }
 0x940   :  { %v1598_v46 = vpop.f32.mrf.mxu1 }
 0x941   :  { %1605 = vst [vmem:[#allocation2 + $0x10] sm:$0xff] %v1598_v46 }
 0x942   :  { %v1975_v52 = vpop.f32.mrf.mxu1 }
 0x944   :  { %v1601_v14 = vpop.f32.mrf.mxu1 }
 0x945   :  { %1606 = vst [vmem:[#allocation2 + $0x18] sm:$0xff] %v1601_v14 }
 0x946   :  { %v1976_v15 = vpop.f32.mrf.mxu1 }
 0x947   :  { %2076 = shalt.err (!%p2073_p4)
}
 0x948   :  { %s2091_s3 = smov 128   ;;  %s2092_s17 = smov 8  }
 0x949   :  { %1618 = dma.vmem_to_hbm [thread:$0]  %s1613_s16, 512, %s2473_s7, [#allocation3], %s2091_s3, %s2091_s3, %s2092_s17  }
 0x94a   :  { %2085 = dma.done.wait [#allocation3], 512  }
 0x94b   :  { %2086 = vsyncadd [#allocation3], 4294966784 }
 0x94c   :  { %1622 = vsyncpa [#allocation3], 1 }

</bundles_post_ra>
